<compile_context>
chip_gen: v5e
topology: v5e:2x2
jax: 0.10.0
libtpu: 0.0.40
codegen_flags: <defaults>
</compile_context>

<pallas_src>
import functools

import numpy as np
import jax
import jax.numpy as jnp
from jax import lax
from jax.experimental import pallas as pl
from jax.experimental.pallas import tpu as pltpu

COMPUTE_DTYPE = jnp.bfloat16   # MXU operand dtype; accumulation is always f32

_CompilerParams = getattr(pltpu, "CompilerParams", None) or getattr(pltpu, "TPUCompilerParams")


def _round_up(x, m):
    return (x + m - 1) // m * m


def _vmem_limit_bytes():
    """Per-generation VMEM budget picked at trace time (v5e/v6e 128 MiB, v7x 64 MiB)."""
    try:
        cap = int(pltpu.get_tpu_info().vmem_capacity_bytes)
        return min(cap // 2, 64 * 1024 * 1024)
    except Exception:
        return 32 * 1024 * 1024


def derive_dims(h, w):
    """Static per-stage sizes + padded 'frame' row counts used by the fused kernel."""
    assert h % 4 == 0 and w % 4 == 0, "input H/W must be multiples of 4"
    h1, w1 = (h - 8) // 4 + 1, (w - 8) // 4 + 1        # conv1 (8x8 / s4)
    h2, w2 = (h1 - 4) // 2 + 1, (w1 - 4) // 2 + 1      # conv2 (4x4 / s2)
    h3, w3 = h2 - 2, w2 - 2                            # conv3 (3x3 / s1)
    assert h1 >= 4 and w1 >= 4 and h3 > 0 and w3 > 0, "image too small for the conv stack"
    fh, fw = h2 + 1, w2 + 1                            # conv1 space-to-depth(2) frame
    r3 = _round_up((h3 - 1) * fw + w3, 8)              # conv3 frame rows computed
    r2 = _round_up(r3 + 2 * fw + 2, 8)                 # conv2 frame rows computed
    a1 = _round_up(max(fh * fw, r2 + fw + 1), 8)       # conv1 frame rows materialized
    return dict(h1=h1, w1=w1, h2=h2, w2=w2, h3=h3, w3=w3, fh=fh, fw=fw,
                r3=r3, r2=r2, a1=a1)


# -----------------------------------------------------------------------------
# The fused kernel: conv1 GEMM -> conv2 -> conv3 -> spatial softmax -> fc1 -> fc2
# -----------------------------------------------------------------------------
def _vision_fused_kernel(p1_ref, w1_ref, b1_ref, w2_ref, b2_ref, w3_ref, b3_ref,
                         aux_ref, wf1_ref, bf1_ref, wf2_ref, bf2_ref, o_ref,
                         a1_s, a2_s, *, fw, r2, r3):
    f32 = jnp.float32

    # conv1 (space-to-depth form): one GEMM -> lane-dense (A1, 4*32) frame.
    a1 = jnp.dot(p1_ref[...], w1_ref[...], preferred_element_type=f32)
    a1 = jnp.maximum(a1 + b1_ref[...], 0.0)
    # Round to bf16 (matches the reference cast points) but keep the scratch f32 so
    # the unaligned shifted-row loads below stay on the plain (8,128) layout.
    a1_s[...] = a1.astype(COMPUTE_DTYPE).astype(f32)

    # conv2: 2x2 / stride-1 conv over the (FH, FW, 128) frame via flat row shifts.
    acc2 = None
    for blk, s in enumerate((0, 1, fw, fw + 1)):
        lhs = a1_s[pl.ds(s, r2), :].astype(COMPUTE_DTYPE)
        t = jnp.dot(lhs, w2_ref[blk], preferred_element_type=f32)
        acc2 = t if acc2 is None else acc2 + t
    a2 = jnp.maximum(acc2 + b2_ref[...], 0.0)
    a2_s[...] = a2.astype(COMPUTE_DTYPE).astype(f32)

    # conv3: 3x3 / stride-1 conv via flat row shifts.
    acc3 = None
    for k in range(9):
        s = (k // 3) * fw + (k % 3)
        lhs = a2_s[pl.ds(s, r3), :].astype(COMPUTE_DTYPE)
        t = jnp.dot(lhs, w3_ref[k], preferred_element_type=f32)
        acc3 = t if acc3 is None else acc3 + t
    z = jnp.maximum(acc3 + b3_ref[...], 0.0)            # (r3, C) f32

    # Spatial softmax + soft-argmax keypoints.
    # aux planes: [0]=x coords, [1]=y coords, [2]=additive mask (0 valid / -1e30 pad).
    zm = z + aux_ref[2]
    m = jnp.max(zm, axis=0, keepdims=True)
    e = jnp.exp(zm - m)
    inv = pl.reciprocal(jnp.sum(e, axis=0, keepdims=True), approx=True)
    fx = jnp.sum(e * aux_ref[0], axis=0, keepdims=True) * inv      # (1, C)
    fy = jnp.sum(e * aux_ref[1], axis=0, keepdims=True) * inv      # (1, C)
    feats = jnp.concatenate([fx, fy], axis=-1)                      # (1, 2C), lane-dense

    # fc1 (ReLU) -> fc2.
    h = jnp.dot(feats.astype(wf1_ref.dtype), wf1_ref[...], preferred_element_type=f32)
    h = jnp.maximum(h + bf1_ref[...], 0.0)
    out = jnp.dot(h.astype(wf2_ref.dtype), wf2_ref[...], preferred_element_type=f32)
    o_ref[...] = (out + bf2_ref[...]).astype(o_ref.dtype)


def _fused_forward(p1, kp, aux, dims):
    n, a1_rows, k1e = p1.shape
    c1x4 = kp["w1e"].shape[1]
    c2 = kp["w2e"].shape[2]
    c3 = kp["w3e"].shape[2]
    d1 = kp["wf1"].shape[1]
    d2 = kp["wf2"].shape[1]
    fw, r2, r3 = dims["fw"], dims["r2"], dims["r3"]

    kernel = functools.partial(_vision_fused_kernel, fw=fw, r2=r2, r3=r3)
    out = pl.pallas_call(
        kernel,
        out_shape=jax.ShapeDtypeStruct((n, 1, d2), jnp.float32),
        grid_spec=pltpu.PrefetchScalarGridSpec(
            num_scalar_prefetch=0,
            grid=(n,),
            in_specs=[
                pl.BlockSpec((None, a1_rows, k1e), lambda i: (i, 0, 0)),
                pl.BlockSpec((k1e, c1x4), lambda i: (0, 0)),
                pl.BlockSpec((1, c1x4), lambda i: (0, 0)),
                pl.BlockSpec((4, c1x4, c2), lambda i: (0, 0, 0)),
                pl.BlockSpec((1, c2), lambda i: (0, 0)),
                pl.BlockSpec((9, c2, c3), lambda i: (0, 0, 0)),
                pl.BlockSpec((1, c3), lambda i: (0, 0)),
                pl.BlockSpec((3, r3, c3), lambda i: (0, 0, 0)),
                pl.BlockSpec((2 * c3, d1), lambda i: (0, 0)),
                pl.BlockSpec((1, d1), lambda i: (0, 0)),
                pl.BlockSpec((d1, d2), lambda i: (0, 0)),
                pl.BlockSpec((1, d2), lambda i: (0, 0)),
            ],
            out_specs=pl.BlockSpec((None, 1, d2), lambda i: (i, 0, 0)),
            scratch_shapes=[
                pltpu.VMEM((a1_rows, c1x4), jnp.float32),   # conv1 frame
                pltpu.VMEM((r2, c2), jnp.float32),          # conv2 frame
            ],
        ),
        compiler_params=_CompilerParams(
            dimension_semantics=("parallel",),
            vmem_limit_bytes=_vmem_limit_bytes(),
        ),
    )(p1, kp["w1e"], kp["b1e"], kp["w2e"], kp["b2"], kp["w3e"], kp["b3"],
      aux, kp["wf1"], kp["bf1"], kp["wf2"], kp["bf2"])
    return out.reshape(n, d2)


# -----------------------------------------------------------------------------
# Forward pass: cheap one-off XLA layout prep, then the single fused kernel call.
# -----------------------------------------------------------------------------
def vision_network_forward(x_nchw, kp, aux):
    """x_nchw: (N, C, H, W) float32, exactly like the PyTorch module."""
    n, cin, h, w = x_nchw.shape
    dims = derive_dims(h, w)
    fh, fw, a1 = dims["fh"], dims["fw"], dims["a1"]
    h4, w4 = h // 4, w // 4
    c16 = 16 * cin

    # Cast to bf16 FIRST, then one layout shuffle: NCHW -> space-to-depth(4) NHWC.
    x4 = (x_nchw.astype(COMPUTE_DTYPE)
          .reshape(n, cin, h4, 4, w4, 4)
          .transpose(0, 2, 4, 3, 5, 1)             # (N, H/4, W/4, bh, bw, Cin)
          .reshape(n, h4, w4, c16))

    # conv1 patches: 3x3 window / stride 2 over the space-to-depth grid.  Each frame
    # row (I, J) carries the union of inputs for the 2x2 block of conv1 outputs
    # (2I+p, 2J+q); the expanded conv1 weight emits all four at once.
    cols = []
    for kh in range(3):
        for kw in range(3):
            cols.append(lax.slice(
                x4,
                (0, kh, kw, 0),
                (n, kh + 2 * (fh - 1) + 1, kw + 2 * (fw - 1) + 1, c16),
                (1, 2, 2, 1)))
    p1 = jnp.concatenate(cols, axis=-1).reshape(n, fh * fw, 9 * c16)
    if a1 > fh * fw:
        p1 = jnp.pad(p1, ((0, 0), (0, a1 - fh * fw), (0, 0)))
    return _fused_forward(p1, kp, aux, dims)


# -----------------------------------------------------------------------------
# One-time parameter / constant preparation (outside the hot path)
# -----------------------------------------------------------------------------
def prepare_params(params, compute_dtype=COMPUTE_DTYPE):
    """Convert PyTorch-layout params into the fused-kernel layouts (done once)."""
    w1 = np.asarray(params["conv1_w"], np.float32)           # (32, Cin, 8, 8)
    co1, cin = w1.shape[0], w1.shape[1]
    c16 = 16 * cin

    # conv1 expanded weight: rows = (kh3, kw3, bh, bw, cin) patch columns,
    # cols = (p, q, co) -> the four conv1 outputs of one space-to-depth(2) frame cell.
    w1e = np.zeros((9 * c16, 4 * co1), np.float32)
    for p in range(2):
        for q in range(2):
            col0 = (p * 2 + q) * co1
            for dh in range(8):
                for dw in range(8):
                    kh3, kw3 = p + dh // 4, q + dw // 4
                    row0 = (kh3 * 3 + kw3) * c16 + ((dh % 4) * 4 + (dw % 4)) * cin
                    w1e[row0:row0 + cin, col0:col0 + co1] = w1[:, :, dh, dw].T
    b1e = np.tile(np.asarray(params["conv1_b"], np.float32), 4)

    # conv2 as a 2x2 / stride-1 conv over the frame: one (128, 64) block per shift.
    w2 = np.asarray(params["conv2_w"], np.float32)            # (64, 32, 4, 4)
    co2 = w2.shape[0]
    w2e = np.zeros((4, 4 * co1, co2), np.float32)
    for kh in range(2):
        for kw in range(2):
            for p in range(2):
                for q in range(2):
                    r0 = (p * 2 + q) * co1
                    w2e[kh * 2 + kw, r0:r0 + co1, :] = w2[:, :, 2 * kh + p, 2 * kw + q].T

    # conv3: one (64, 64) block per (dh, dw) shift.
    w3 = np.asarray(params["conv3_w"], np.float32)            # (64, 64, 3, 3)
    co3 = w3.shape[0]
    w3e = np.zeros((9, co2, co3), np.float32)
    for dh in range(3):
        for dw in range(3):
            w3e[dh * 3 + dw] = w3[:, :, dh, dw].T

    # fc1 columns permuted once so the concatenated [x..., y...] keypoint layout
    # matches PyTorch's interleaved (x0, y0, x1, y1, ...).
    idx = np.concatenate([2 * np.arange(co3), 2 * np.arange(co3) + 1])
    fc1_wm = np.asarray(params["fc1_w"], np.float32)[:, idx].T      # (2*C, 512)
    fc2_wm = np.asarray(params["fc2_w"], np.float32).T              # (512, d_model)

    def row(b):
        return jnp.asarray(np.asarray(b, np.float32).reshape(1, -1))

    cd = compute_dtype
    return {
        "w1e": jnp.asarray(w1e, cd), "b1e": row(b1e),
        "w2e": jnp.asarray(w2e, cd), "b2": row(params["conv2_b"]),
        "w3e": jnp.asarray(w3e, cd), "b3": row(params["conv3_b"]),
        "wf1": jnp.asarray(fc1_wm, cd), "bf1": row(params["fc1_b"]),
        "wf2": jnp.asarray(fc2_wm, cd), "bf2": row(params["fc2_b"]),
    }


def make_aux(dims, c):
    """(3, R3, C) f32: x-coord grid, y-coord grid, additive softmax mask over the
    conv3 frame rows (linspace(0,1), 'xy' convention, like the PyTorch module)."""
    h3, w3, fw, r3 = dims["h3"], dims["w3"], dims["fw"], dims["r3"]
    xs = np.linspace(0.0, 1.0, w3)
    ys = np.linspace(0.0, 1.0, h3)
    cx = np.zeros((r3,), np.float32)
    cy = np.zeros((r3,), np.float32)
    msk = np.full((r3,), -1e30, np.float32)
    for u in range(h3):
        for v in range(w3):
            r = u * fw + v
            cx[r], cy[r], msk[r] = xs[v], ys[u], 0.0
    aux = np.stack([cx, cy, msk], axis=0)[:, :, None]
    return jnp.asarray(np.broadcast_to(aux, (3, r3, c)).astype(np.float32))


def init_params(key, img_channels, d_model):
    ks = jax.random.split(key, 10)

    def w(k, shape, fan_in):
        return (jax.random.normal(k, shape, jnp.float32) / jnp.sqrt(fan_in)).astype(jnp.float32)

    return {
        "conv1_w": w(ks[0], (32, img_channels, 8, 8), img_channels * 64),
        "conv1_b": w(ks[1], (32,), 32),
        "conv2_w": w(ks[2], (64, 32, 4, 4), 32 * 16),
        "conv2_b": w(ks[3], (64,), 64),
        "conv3_w": w(ks[4], (64, 64, 3, 3), 64 * 9),
        "conv3_b": w(ks[5], (64,), 64),
        "fc1_w": w(ks[6], (512, 2 * 64), 128),
        "fc1_b": w(ks[7], (512,), 512),
        "fc2_w": w(ks[8], (d_model, 512), 512),
        "fc2_b": w(ks[9], (d_model,), d_model),
    }


# -----------------------------------------------------------------------------
# Pure-XLA reference mirroring the kernel's cast points (bf16 MXU ops, f32 accum)
# -----------------------------------------------------------------------------
def reference_forward(x, params, compute_dtype=COMPUTE_DTYPE):
    cdt = compute_dtype

    def conv_relu(h, w, b, s):
        y = lax.conv_general_dilated(
            h.astype(cdt), w.astype(cdt), window_strides=(s, s), padding="VALID",
            dimension_numbers=("NCHW", "OIHW", "NCHW"),
            preferred_element_type=jnp.float32)
        return jnp.maximum(y + b[None, :, None, None], 0.0)

    a = conv_relu(x, params["conv1_w"], params["conv1_b"], 4)
    a = conv_relu(a, params["conv2_w"], params["conv2_b"], 2)
    pre = conv_relu(a, params["conv3_w"], params["conv3_b"], 1)        # f32

    N, C, H, W = pre.shape
    sm = jax.nn.softmax(pre.reshape(N * C, H * W), axis=1).reshape(N, C, H, W)
    xc = jnp.linspace(0.0, 1.0, W, dtype=jnp.float32)
    yc = jnp.linspace(0.0, 1.0, H, dtype=jnp.float32)
    X, Y = jnp.meshgrid(xc, yc, indexing="xy")
    coords = jnp.stack([X, Y], axis=-1)                                 # (H, W, 2)
    feats = jnp.sum(sm[..., None] * coords[None, None], axis=(2, 3)).reshape(N, 2 * C)

    h = jnp.dot(feats.astype(cdt), params["fc1_w"].T.astype(cdt),
                preferred_element_type=jnp.float32) + params["fc1_b"]
    h = jnp.maximum(h, 0.0)
    return jnp.dot(h.astype(cdt), params["fc2_w"].T.astype(cdt),
                   preferred_element_type=jnp.float32) + params["fc2_b"]


if __name__ == "__main__":
    # 64x64 input survives the 8/4, 4/2, 3/1 conv stack (64 -> 15 -> 6 -> 4 spatial).
    batch, img_channels, img_h, img_w = 2, 3, 64, 64
    d_model = 32

    key = jax.random.PRNGKey(0)
    k_x, k_p = jax.random.split(key)
    x = jax.random.normal(k_x, (batch, img_channels, img_h, img_w), jnp.float32)
    params = init_params(k_p, img_channels, d_model)

    # One-time setup: kernel-layout params + hoisted coords/mask constant.
    kparams = prepare_params(params)
    dims = derive_dims(img_h, img_w)
    aux = make_aux(dims, params["conv3_w"].shape[0])

    fwd = jax.jit(vision_network_forward)
    out = jax.block_until_ready(fwd(x, kparams, aux))

    assert out.shape == (batch, d_model), out.shape
    assert bool(jnp.all(jnp.isfinite(out)))

    # Numerical check against a pure-XLA reference with matching bf16 cast points.
    ref = jax.block_until_ready(jax.jit(reference_forward)(x, params))
    max_err = float(jnp.max(jnp.abs(out - ref)))
    assert max_err < 2e-2, max_err

    print("KERNEL_OK")
</pallas_src>

<mosaic_0001>
module attributes {stable_mosaic.version = 11 : i64} {
  func.func @_vision_fused_kernel(%arg0: i32, %arg1: memref<1x56x432xbf16, #tpu.memory_space<vmem>>, %arg2: memref<432x128xbf16, #tpu.memory_space<vmem>>, %arg3: memref<1x128xf32, #tpu.memory_space<vmem>>, %arg4: memref<4x128x64xbf16, #tpu.memory_space<vmem>>, %arg5: memref<1x64xf32, #tpu.memory_space<vmem>>, %arg6: memref<9x64x64xbf16, #tpu.memory_space<vmem>>, %arg7: memref<1x64xf32, #tpu.memory_space<vmem>>, %arg8: memref<3x32x64xf32, #tpu.memory_space<vmem>>, %arg9: memref<128x512xbf16, #tpu.memory_space<vmem>>, %arg10: memref<1x512xf32, #tpu.memory_space<vmem>>, %arg11: memref<512x32xbf16, #tpu.memory_space<vmem>>, %arg12: memref<1x32xf32, #tpu.memory_space<vmem>>, %arg13: memref<1x1x32xf32, #tpu.memory_space<vmem>>, %arg14: memref<56x128xf32, #tpu.memory_space<vmem>>, %arg15: memref<48x64xf32, #tpu.memory_space<vmem>>) attributes {dimension_semantics = [#tpu.dimension_semantics<parallel>], iteration_bounds = array<i64: 2>, scalar_prefetch = 0 : i64, scratch_operands = 2 : i64, tpu.core_type = #tpu.core_type<tc>, window_params = [{transform_indices = @transform_0, window_bounds = array<i64: 1, 56, 432>}, {pipeline_mode = #tpu.pipeline_mode<synchronous>, transform_indices = @transform_1, window_bounds = array<i64: 432, 128>}, {pipeline_mode = #tpu.pipeline_mode<synchronous>, transform_indices = @transform_2, window_bounds = array<i64: 1, 128>}, {pipeline_mode = #tpu.pipeline_mode<synchronous>, transform_indices = @transform_3, window_bounds = array<i64: 4, 128, 64>}, {pipeline_mode = #tpu.pipeline_mode<synchronous>, transform_indices = @transform_4, window_bounds = array<i64: 1, 64>}, {pipeline_mode = #tpu.pipeline_mode<synchronous>, transform_indices = @transform_5, window_bounds = array<i64: 9, 64, 64>}, {pipeline_mode = #tpu.pipeline_mode<synchronous>, transform_indices = @transform_6, window_bounds = array<i64: 1, 64>}, {pipeline_mode = #tpu.pipeline_mode<synchronous>, transform_indices = @transform_7, window_bounds = array<i64: 3, 32, 64>}, {pipeline_mode = #tpu.pipeline_mode<synchronous>, transform_indices = @transform_8, window_bounds = array<i64: 128, 512>}, {pipeline_mode = #tpu.pipeline_mode<synchronous>, transform_indices = @transform_9, window_bounds = array<i64: 1, 512>}, {pipeline_mode = #tpu.pipeline_mode<synchronous>, transform_indices = @transform_10, window_bounds = array<i64: 512, 32>}, {pipeline_mode = #tpu.pipeline_mode<synchronous>, transform_indices = @transform_11, window_bounds = array<i64: 1, 32>}, {transform_indices = @transform_12, window_bounds = array<i64: 1, 1, 32>}]} {
    %c0 = arith.constant 0 : index
    %c0_0 = arith.constant 0 : index
    %c0_1 = arith.constant 0 : index
    %0 = vector.load %arg1[%c0, %c0_0, %c0_1] : memref<1x56x432xbf16, #tpu.memory_space<vmem>>, vector<1x56x432xbf16>
    %1 = vector.shape_cast %0 : vector<1x56x432xbf16> to vector<56x432xbf16>
    %c0_2 = arith.constant 0 : index
    %c0_3 = arith.constant 0 : index
    %2 = vector.load %arg2[%c0_2, %c0_3] : memref<432x128xbf16, #tpu.memory_space<vmem>>, vector<432x128xbf16>
    %cst = arith.constant dense<0.000000e+00> : vector<56x128xf32>
    %3 = tpu.matmul %1, %2, %cst {dimension_numbers = #tpu.dot_dimension_numbers<[1], [0], [0], [1], [0, 0, 1, 1], [], []>} : vector<56x432xbf16>, vector<432x128xbf16>, vector<56x128xf32> -> vector<56x128xf32>
    %c0_4 = arith.constant 0 : index
    %c0_5 = arith.constant 0 : index
    %4 = vector.load %arg3[%c0_4, %c0_5] : memref<1x128xf32, #tpu.memory_space<vmem>>, vector<1x128xf32>
    %5 = vector.broadcast %4 : vector<1x128xf32> to vector<56x128xf32>
    %6 = arith.addf %3, %5 : vector<56x128xf32>
    %cst_6 = arith.constant 0.000000e+00 : f32
    %7 = vector.broadcast %cst_6 : f32 to vector<56x128xf32>
    %8 = arith.maximumf %6, %7 : vector<56x128xf32>
    %9 = arith.truncf %8 : vector<56x128xf32> to vector<56x128xbf16>
    %10 = arith.extf %9 : vector<56x128xbf16> to vector<56x128xf32>
    %c0_7 = arith.constant 0 : index
    %c0_8 = arith.constant 0 : index
    %11 = vector.load %arg14[%c0_7, %c0_8] : memref<56x128xf32, #tpu.memory_space<vmem>>, vector<56x128xf32>
    tpu.vector_store %arg14[%c0_7, %c0_8], %10 {strides = array<i32>} : memref<56x128xf32, #tpu.memory_space<vmem>>, vector<56x128xf32>,
    %c0_9 = arith.constant 0 : index
    %c0_10 = arith.constant 0 : index
    %12 = vector.load %arg14[%c0_9, %c0_10] : memref<56x128xf32, #tpu.memory_space<vmem>>, vector<48x128xf32>
    %13 = arith.truncf %12 : vector<48x128xf32> to vector<48x128xbf16>
    %c0_11 = arith.constant 0 : index
    %c0_12 = arith.constant 0 : index
    %c0_13 = arith.constant 0 : index
    %14 = vector.load %arg4[%c0_11, %c0_12, %c0_13] : memref<4x128x64xbf16, #tpu.memory_space<vmem>>, vector<1x128x64xbf16>
    %15 = vector.shape_cast %14 : vector<1x128x64xbf16> to vector<128x64xbf16>
    %cst_14 = arith.constant dense<0.000000e+00> : vector<48x64xf32>
    %16 = tpu.matmul %13, %15, %cst_14 {dimension_numbers = #tpu.dot_dimension_numbers<[1], [0], [0], [1], [0, 0, 1, 1], [], []>} : vector<48x128xbf16>, vector<128x64xbf16>, vector<48x64xf32> -> vector<48x64xf32>
    %c1 = arith.constant 1 : index
    %c0_15 = arith.constant 0 : index
    %17 = vector.load %arg14[%c1, %c0_15] : memref<56x128xf32, #tpu.memory_space<vmem>>, vector<48x128xf32>
    %18 = arith.truncf %17 : vector<48x128xf32> to vector<48x128xbf16>
    %c1_16 = arith.constant 1 : index
    %c0_17 = arith.constant 0 : index
    %c0_18 = arith.constant 0 : index
    %19 = vector.load %arg4[%c1_16, %c0_17, %c0_18] : memref<4x128x64xbf16, #tpu.memory_space<vmem>>, vector<1x128x64xbf16>
    %20 = vector.shape_cast %19 : vector<1x128x64xbf16> to vector<128x64xbf16>
    %cst_19 = arith.constant dense<0.000000e+00> : vector<48x64xf32>
    %21 = tpu.matmul %18, %20, %cst_19 {dimension_numbers = #tpu.dot_dimension_numbers<[1], [0], [0], [1], [0, 0, 1, 1], [], []>} : vector<48x128xbf16>, vector<128x64xbf16>, vector<48x64xf32> -> vector<48x64xf32>
    %22 = arith.addf %16, %21 : vector<48x64xf32>
    %c7 = arith.constant 7 : index
    %c0_20 = arith.constant 0 : index
    %23 = vector.load %arg14[%c7, %c0_20] : memref<56x128xf32, #tpu.memory_space<vmem>>, vector<48x128xf32>
    %24 = arith.truncf %23 : vector<48x128xf32> to vector<48x128xbf16>
    %c2 = arith.constant 2 : index
    %c0_21 = arith.constant 0 : index
    %c0_22 = arith.constant 0 : index
    %25 = vector.load %arg4[%c2, %c0_21, %c0_22] : memref<4x128x64xbf16, #tpu.memory_space<vmem>>, vector<1x128x64xbf16>
    %26 = vector.shape_cast %25 : vector<1x128x64xbf16> to vector<128x64xbf16>
    %cst_23 = arith.constant dense<0.000000e+00> : vector<48x64xf32>
    %27 = tpu.matmul %24, %26, %cst_23 {dimension_numbers = #tpu.dot_dimension_numbers<[1], [0], [0], [1], [0, 0, 1, 1], [], []>} : vector<48x128xbf16>, vector<128x64xbf16>, vector<48x64xf32> -> vector<48x64xf32>
    %28 = arith.addf %22, %27 : vector<48x64xf32>
    %c8 = arith.constant 8 : index
    %c0_24 = arith.constant 0 : index
    %29 = vector.load %arg14[%c8, %c0_24] : memref<56x128xf32, #tpu.memory_space<vmem>>, vector<48x128xf32>
    %30 = arith.truncf %29 : vector<48x128xf32> to vector<48x128xbf16>
    %c3 = arith.constant 3 : index
    %c0_25 = arith.constant 0 : index
    %c0_26 = arith.constant 0 : index
    %31 = vector.load %arg4[%c3, %c0_25, %c0_26] : memref<4x128x64xbf16, #tpu.memory_space<vmem>>, vector<1x128x64xbf16>
    %32 = vector.shape_cast %31 : vector<1x128x64xbf16> to vector<128x64xbf16>
    %cst_27 = arith.constant dense<0.000000e+00> : vector<48x64xf32>
    %33 = tpu.matmul %30, %32, %cst_27 {dimension_numbers = #tpu.dot_dimension_numbers<[1], [0], [0], [1], [0, 0, 1, 1], [], []>} : vector<48x128xbf16>, vector<128x64xbf16>, vector<48x64xf32> -> vector<48x64xf32>
    %34 = arith.addf %28, %33 : vector<48x64xf32>
    %c0_28 = arith.constant 0 : index
    %c0_29 = arith.constant 0 : index
    %35 = vector.load %arg5[%c0_28, %c0_29] : memref<1x64xf32, #tpu.memory_space<vmem>>, vector<1x64xf32>
    %36 = vector.broadcast %35 : vector<1x64xf32> to vector<48x64xf32>
    %37 = arith.addf %34, %36 : vector<48x64xf32>
    %cst_30 = arith.constant 0.000000e+00 : f32
    %38 = vector.broadcast %cst_30 : f32 to vector<48x64xf32>
    %39 = arith.maximumf %37, %38 : vector<48x64xf32>
    %40 = arith.truncf %39 : vector<48x64xf32> to vector<48x64xbf16>
    %41 = arith.extf %40 : vector<48x64xbf16> to vector<48x64xf32>
    %c0_31 = arith.constant 0 : index
    %c0_32 = arith.constant 0 : index
    %42 = vector.load %arg15[%c0_31, %c0_32] : memref<48x64xf32, #tpu.memory_space<vmem>>, vector<48x64xf32>
    tpu.vector_store %arg15[%c0_31, %c0_32], %41 {strides = array<i32>} : memref<48x64xf32, #tpu.memory_space<vmem>>, vector<48x64xf32>,
    %c0_33 = arith.constant 0 : index
    %c0_34 = arith.constant 0 : index
    %43 = vector.load %arg15[%c0_33, %c0_34] : memref<48x64xf32, #tpu.memory_space<vmem>>, vector<32x64xf32>
    %44 = arith.truncf %43 : vector<32x64xf32> to vector<32x64xbf16>
    %c0_35 = arith.constant 0 : index
    %c0_36 = arith.constant 0 : index
    %c0_37 = arith.constant 0 : index
    %45 = vector.load %arg6[%c0_35, %c0_36, %c0_37] : memref<9x64x64xbf16, #tpu.memory_space<vmem>>, vector<1x64x64xbf16>
    %46 = vector.shape_cast %45 : vector<1x64x64xbf16> to vector<64x64xbf16>
    %cst_38 = arith.constant dense<0.000000e+00> : vector<32x64xf32>
    %47 = tpu.matmul %44, %46, %cst_38 {dimension_numbers = #tpu.dot_dimension_numbers<[1], [0], [0], [1], [0, 0, 1, 1], [], []>} : vector<32x64xbf16>, vector<64x64xbf16>, vector<32x64xf32> -> vector<32x64xf32>
    %c1_39 = arith.constant 1 : index
    %c0_40 = arith.constant 0 : index
    %48 = vector.load %arg15[%c1_39, %c0_40] : memref<48x64xf32, #tpu.memory_space<vmem>>, vector<32x64xf32>
    %49 = arith.truncf %48 : vector<32x64xf32> to vector<32x64xbf16>
    %c1_41 = arith.constant 1 : index
    %c0_42 = arith.constant 0 : index
    %c0_43 = arith.constant 0 : index
    %50 = vector.load %arg6[%c1_41, %c0_42, %c0_43] : memref<9x64x64xbf16, #tpu.memory_space<vmem>>, vector<1x64x64xbf16>
    %51 = vector.shape_cast %50 : vector<1x64x64xbf16> to vector<64x64xbf16>
    %cst_44 = arith.constant dense<0.000000e+00> : vector<32x64xf32>
    %52 = tpu.matmul %49, %51, %cst_44 {dimension_numbers = #tpu.dot_dimension_numbers<[1], [0], [0], [1], [0, 0, 1, 1], [], []>} : vector<32x64xbf16>, vector<64x64xbf16>, vector<32x64xf32> -> vector<32x64xf32>
    %53 = arith.addf %47, %52 : vector<32x64xf32>
    %c2_45 = arith.constant 2 : index
    %c0_46 = arith.constant 0 : index
    %54 = vector.load %arg15[%c2_45, %c0_46] : memref<48x64xf32, #tpu.memory_space<vmem>>, vector<32x64xf32>
    %55 = arith.truncf %54 : vector<32x64xf32> to vector<32x64xbf16>
    %c2_47 = arith.constant 2 : index
    %c0_48 = arith.constant 0 : index
    %c0_49 = arith.constant 0 : index
    %56 = vector.load %arg6[%c2_47, %c0_48, %c0_49] : memref<9x64x64xbf16, #tpu.memory_space<vmem>>, vector<1x64x64xbf16>
    %57 = vector.shape_cast %56 : vector<1x64x64xbf16> to vector<64x64xbf16>
    %cst_50 = arith.constant dense<0.000000e+00> : vector<32x64xf32>
    %58 = tpu.matmul %55, %57, %cst_50 {dimension_numbers = #tpu.dot_dimension_numbers<[1], [0], [0], [1], [0, 0, 1, 1], [], []>} : vector<32x64xbf16>, vector<64x64xbf16>, vector<32x64xf32> -> vector<32x64xf32>
    %59 = arith.addf %53, %58 : vector<32x64xf32>
    %c7_51 = arith.constant 7 : index
    %c0_52 = arith.constant 0 : index
    %60 = vector.load %arg15[%c7_51, %c0_52] : memref<48x64xf32, #tpu.memory_space<vmem>>, vector<32x64xf32>
    %61 = arith.truncf %60 : vector<32x64xf32> to vector<32x64xbf16>
    %c3_53 = arith.constant 3 : index
    %c0_54 = arith.constant 0 : index
    %c0_55 = arith.constant 0 : index
    %62 = vector.load %arg6[%c3_53, %c0_54, %c0_55] : memref<9x64x64xbf16, #tpu.memory_space<vmem>>, vector<1x64x64xbf16>
    %63 = vector.shape_cast %62 : vector<1x64x64xbf16> to vector<64x64xbf16>
    %cst_56 = arith.constant dense<0.000000e+00> : vector<32x64xf32>
    %64 = tpu.matmul %61, %63, %cst_56 {dimension_numbers = #tpu.dot_dimension_numbers<[1], [0], [0], [1], [0, 0, 1, 1], [], []>} : vector<32x64xbf16>, vector<64x64xbf16>, vector<32x64xf32> -> vector<32x64xf32>
    %65 = arith.addf %59, %64 : vector<32x64xf32>
    %c8_57 = arith.constant 8 : index
    %c0_58 = arith.constant 0 : index
    %66 = vector.load %arg15[%c8_57, %c0_58] : memref<48x64xf32, #tpu.memory_space<vmem>>, vector<32x64xf32>
    %67 = arith.truncf %66 : vector<32x64xf32> to vector<32x64xbf16>
    %c4 = arith.constant 4 : index
    %c0_59 = arith.constant 0 : index
    %c0_60 = arith.constant 0 : index
    %68 = vector.load %arg6[%c4, %c0_59, %c0_60] : memref<9x64x64xbf16, #tpu.memory_space<vmem>>, vector<1x64x64xbf16>
    %69 = vector.shape_cast %68 : vector<1x64x64xbf16> to vector<64x64xbf16>
    %cst_61 = arith.constant dense<0.000000e+00> : vector<32x64xf32>
    %70 = tpu.matmul %67, %69, %cst_61 {dimension_numbers = #tpu.dot_dimension_numbers<[1], [0], [0], [1], [0, 0, 1, 1], [], []>} : vector<32x64xbf16>, vector<64x64xbf16>, vector<32x64xf32> -> vector<32x64xf32>
    %71 = arith.addf %65, %70 : vector<32x64xf32>
    %c9 = arith.constant 9 : index
    %c0_62 = arith.constant 0 : index
    %72 = vector.load %arg15[%c9, %c0_62] : memref<48x64xf32, #tpu.memory_space<vmem>>, vector<32x64xf32>
    %73 = arith.truncf %72 : vector<32x64xf32> to vector<32x64xbf16>
    %c5 = arith.constant 5 : index
    %c0_63 = arith.constant 0 : index
    %c0_64 = arith.constant 0 : index
    %74 = vector.load %arg6[%c5, %c0_63, %c0_64] : memref<9x64x64xbf16, #tpu.memory_space<vmem>>, vector<1x64x64xbf16>
    %75 = vector.shape_cast %74 : vector<1x64x64xbf16> to vector<64x64xbf16>
    %cst_65 = arith.constant dense<0.000000e+00> : vector<32x64xf32>
    %76 = tpu.matmul %73, %75, %cst_65 {dimension_numbers = #tpu.dot_dimension_numbers<[1], [0], [0], [1], [0, 0, 1, 1], [], []>} : vector<32x64xbf16>, vector<64x64xbf16>, vector<32x64xf32> -> vector<32x64xf32>
    %77 = arith.addf %71, %76 : vector<32x64xf32>
    %c14 = arith.constant 14 : index
    %c0_66 = arith.constant 0 : index
    %78 = vector.load %arg15[%c14, %c0_66] : memref<48x64xf32, #tpu.memory_space<vmem>>, vector<32x64xf32>
    %79 = arith.truncf %78 : vector<32x64xf32> to vector<32x64xbf16>
    %c6 = arith.constant 6 : index
    %c0_67 = arith.constant 0 : index
    %c0_68 = arith.constant 0 : index
    %80 = vector.load %arg6[%c6, %c0_67, %c0_68] : memref<9x64x64xbf16, #tpu.memory_space<vmem>>, vector<1x64x64xbf16>
    %81 = vector.shape_cast %80 : vector<1x64x64xbf16> to vector<64x64xbf16>
    %cst_69 = arith.constant dense<0.000000e+00> : vector<32x64xf32>
    %82 = tpu.matmul %79, %81, %cst_69 {dimension_numbers = #tpu.dot_dimension_numbers<[1], [0], [0], [1], [0, 0, 1, 1], [], []>} : vector<32x64xbf16>, vector<64x64xbf16>, vector<32x64xf32> -> vector<32x64xf32>
    %83 = arith.addf %77, %82 : vector<32x64xf32>
    %c15 = arith.constant 15 : index
    %c0_70 = arith.constant 0 : index
    %84 = vector.load %arg15[%c15, %c0_70] : memref<48x64xf32, #tpu.memory_space<vmem>>, vector<32x64xf32>
    %85 = arith.truncf %84 : vector<32x64xf32> to vector<32x64xbf16>
    %c7_71 = arith.constant 7 : index
    %c0_72 = arith.constant 0 : index
    %c0_73 = arith.constant 0 : index
    %86 = vector.load %arg6[%c7_71, %c0_72, %c0_73] : memref<9x64x64xbf16, #tpu.memory_space<vmem>>, vector<1x64x64xbf16>
    %87 = vector.shape_cast %86 : vector<1x64x64xbf16> to vector<64x64xbf16>
    %cst_74 = arith.constant dense<0.000000e+00> : vector<32x64xf32>
    %88 = tpu.matmul %85, %87, %cst_74 {dimension_numbers = #tpu.dot_dimension_numbers<[1], [0], [0], [1], [0, 0, 1, 1], [], []>} : vector<32x64xbf16>, vector<64x64xbf16>, vector<32x64xf32> -> vector<32x64xf32>
    %89 = arith.addf %83, %88 : vector<32x64xf32>
    %c16 = arith.constant 16 : index
    %c0_75 = arith.constant 0 : index
    %90 = vector.load %arg15[%c16, %c0_75] : memref<48x64xf32, #tpu.memory_space<vmem>>, vector<32x64xf32>
    %91 = arith.truncf %90 : vector<32x64xf32> to vector<32x64xbf16>
    %c8_76 = arith.constant 8 : index
    %c0_77 = arith.constant 0 : index
    %c0_78 = arith.constant 0 : index
    %92 = vector.load %arg6[%c8_76, %c0_77, %c0_78] : memref<9x64x64xbf16, #tpu.memory_space<vmem>>, vector<1x64x64xbf16>
    %93 = vector.shape_cast %92 : vector<1x64x64xbf16> to vector<64x64xbf16>
    %cst_79 = arith.constant dense<0.000000e+00> : vector<32x64xf32>
    %94 = tpu.matmul %91, %93, %cst_79 {dimension_numbers = #tpu.dot_dimension_numbers<[1], [0], [0], [1], [0, 0, 1, 1], [], []>} : vector<32x64xbf16>, vector<64x64xbf16>, vector<32x64xf32> -> vector<32x64xf32>
    %95 = arith.addf %89, %94 : vector<32x64xf32>
    %c0_80 = arith.constant 0 : index
    %c0_81 = arith.constant 0 : index
    %96 = vector.load %arg7[%c0_80, %c0_81] : memref<1x64xf32, #tpu.memory_space<vmem>>, vector<1x64xf32>
    %97 = vector.broadcast %96 : vector<1x64xf32> to vector<32x64xf32>
    %98 = arith.addf %95, %97 : vector<32x64xf32>
    %cst_82 = arith.constant 0.000000e+00 : f32
    %99 = vector.broadcast %cst_82 : f32 to vector<32x64xf32>
    %100 = arith.maximumf %98, %99 : vector<32x64xf32>
    %c2_83 = arith.constant 2 : index
    %c0_84 = arith.constant 0 : index
    %c0_85 = arith.constant 0 : index
    %101 = vector.load %arg8[%c2_83, %c0_84, %c0_85] : memref<3x32x64xf32, #tpu.memory_space<vmem>>, vector<1x32x64xf32>
    %102 = vector.shape_cast %101 : vector<1x32x64xf32> to vector<32x64xf32>
    %103 = arith.addf %100, %102 : vector<32x64xf32>
    %cst_86 = arith.constant dense<0xFF800000> : vector<64xf32>
    %104 = vector.multi_reduction <maximumf>, %103, %cst_86 [0] : vector<32x64xf32> to vector<64xf32>
    %105 = vector.shape_cast %104 : vector<64xf32> to vector<1x64xf32>
    %106 = vector.broadcast %105 : vector<1x64xf32> to vector<32x64xf32>
    %107 = arith.subf %103, %106 : vector<32x64xf32>
    %108 = math.exp %107 : vector<32x64xf32>
    %cst_87 = arith.constant dense<0.000000e+00> : vector<64xf32>
    %109 = vector.multi_reduction <add>, %108, %cst_87 [0] : vector<32x64xf32> to vector<64xf32>
    %110 = vector.shape_cast %109 : vector<64xf32> to vector<1x64xf32>
    %111 = tpu.reciprocal %110 {approx = true} : vector<1x64xf32> -> vector<1x64xf32>
    %c0_88 = arith.constant 0 : index
    %c0_89 = arith.constant 0 : index
    %c0_90 = arith.constant 0 : index
    %112 = vector.load %arg8[%c0_88, %c0_89, %c0_90] : memref<3x32x64xf32, #tpu.memory_space<vmem>>, vector<1x32x64xf32>
    %113 = vector.shape_cast %112 : vector<1x32x64xf32> to vector<32x64xf32>
    %114 = arith.mulf %108, %113 : vector<32x64xf32>
    %cst_91 = arith.constant dense<0.000000e+00> : vector<64xf32>
    %115 = vector.multi_reduction <add>, %114, %cst_91 [0] : vector<32x64xf32> to vector<64xf32>
    %116 = vector.shape_cast %115 : vector<64xf32> to vector<1x64xf32>
    %117 = arith.mulf %116, %111 : vector<1x64xf32>
    %c1_92 = arith.constant 1 : index
    %c0_93 = arith.constant 0 : index
    %c0_94 = arith.constant 0 : index
    %118 = vector.load %arg8[%c1_92, %c0_93, %c0_94] : memref<3x32x64xf32, #tpu.memory_space<vmem>>, vector<1x32x64xf32>
    %119 = vector.shape_cast %118 : vector<1x32x64xf32> to vector<32x64xf32>
    %120 = arith.mulf %108, %119 : vector<32x64xf32>
    %cst_95 = arith.constant dense<0.000000e+00> : vector<64xf32>
    %121 = vector.multi_reduction <add>, %120, %cst_95 [0] : vector<32x64xf32> to vector<64xf32>
    %122 = vector.shape_cast %121 : vector<64xf32> to vector<1x64xf32>
    %123 = arith.mulf %122, %111 : vector<1x64xf32>
    %124 = tpu.concatenate %117, %123 in 1 : vector<1x64xf32>, vector<1x64xf32> -> vector<1x128xf32>
    %125 = arith.truncf %124 : vector<1x128xf32> to vector<1x128xbf16>
    %c0_96 = arith.constant 0 : index
    %c0_97 = arith.constant 0 : index
    %126 = vector.load %arg9[%c0_96, %c0_97] : memref<128x512xbf16, #tpu.memory_space<vmem>>, vector<128x512xbf16>
    %cst_98 = arith.constant dense<0.000000e+00> : vector<1x512xf32>
    %127 = tpu.matmul %125, %126, %cst_98 {dimension_numbers = #tpu.dot_dimension_numbers<[1], [0], [0], [1], [0, 0, 1, 1], [], []>} : vector<1x128xbf16>, vector<128x512xbf16>, vector<1x512xf32> -> vector<1x512xf32>
    %c0_99 = arith.constant 0 : index
    %c0_100 = arith.constant 0 : index
    %128 = vector.load %arg10[%c0_99, %c0_100] : memref<1x512xf32, #tpu.memory_space<vmem>>, vector<1x512xf32>
    %129 = arith.addf %127, %128 : vector<1x512xf32>
    %cst_101 = arith.constant 0.000000e+00 : f32
    %130 = vector.broadcast %cst_101 : f32 to vector<1x512xf32>
    %131 = arith.maximumf %129, %130 : vector<1x512xf32>
    %132 = arith.truncf %131 : vector<1x512xf32> to vector<1x512xbf16>
    %c0_102 = arith.constant 0 : index
    %c0_103 = arith.constant 0 : index
    %133 = vector.load %arg11[%c0_102, %c0_103] : memref<512x32xbf16, #tpu.memory_space<vmem>>, vector<512x32xbf16>
    %cst_104 = arith.constant dense<0.000000e+00> : vector<1x32xf32>
    %134 = tpu.matmul %132, %133, %cst_104 {dimension_numbers = #tpu.dot_dimension_numbers<[1], [0], [0], [1], [0, 0, 1, 1], [], []>} : vector<1x512xbf16>, vector<512x32xbf16>, vector<1x32xf32> -> vector<1x32xf32>
    %c0_105 = arith.constant 0 : index
    %c0_106 = arith.constant 0 : index
    %135 = vector.load %arg12[%c0_105, %c0_106] : memref<1x32xf32, #tpu.memory_space<vmem>>, vector<1x32xf32>
    %136 = arith.addf %134, %135 : vector<1x32xf32>
    %c0_107 = arith.constant 0 : index
    %c0_108 = arith.constant 0 : index
    %c0_109 = arith.constant 0 : index
    %137 = vector.load %arg13[%c0_107, %c0_108, %c0_109] : memref<1x1x32xf32, #tpu.memory_space<vmem>>, vector<1x1x32xf32>
    %138 = vector.shape_cast %137 : vector<1x1x32xf32> to vector<1x32xf32>
    %139 = vector.shape_cast %136 : vector<1x32xf32> to vector<1x1x32xf32>
    tpu.vector_store %arg13[%c0_107, %c0_108, %c0_109], %139 {strides = array<i32>} : memref<1x1x32xf32, #tpu.memory_space<vmem>>, vector<1x1x32xf32>,
    return
  }
  func.func @transform_0(%arg0: i32) -> (i32, i32, i32) {
    %c0_i32 = arith.constant 0 : i32
    %c0_i32_0 = arith.constant 0 : i32
    %c0_i32_1 = arith.constant 0 : i32
    return %arg0, %c0_i32, %c0_i32_0 : i32, i32, i32
  }
  func.func @transform_1(%arg0: i32) -> (i32, i32) {
    %c0_i32 = arith.constant 0 : i32
    %c0_i32_0 = arith.constant 0 : i32
    %c0_i32_1 = arith.constant 0 : i32
    return %c0_i32, %c0_i32_0 : i32, i32
  }
  func.func @transform_2(%arg0: i32) -> (i32, i32) {
    %c0_i32 = arith.constant 0 : i32
    %c0_i32_0 = arith.constant 0 : i32
    %c0_i32_1 = arith.constant 0 : i32
    return %c0_i32, %c0_i32_0 : i32, i32
  }
  func.func @transform_3(%arg0: i32) -> (i32, i32, i32) {
    %c0_i32 = arith.constant 0 : i32
    %c0_i32_0 = arith.constant 0 : i32
    %c0_i32_1 = arith.constant 0 : i32
    %c0_i32_2 = arith.constant 0 : i32
    return %c0_i32, %c0_i32_0, %c0_i32_1 : i32, i32, i32
  }
  func.func @transform_4(%arg0: i32) -> (i32, i32) {
    %c0_i32 = arith.constant 0 : i32
    %c0_i32_0 = arith.constant 0 : i32
    %c0_i32_1 = arith.constant 0 : i32
    return %c0_i32, %c0_i32_0 : i32, i32
  }
  func.func @transform_5(%arg0: i32) -> (i32, i32, i32) {
    %c0_i32 = arith.constant 0 : i32
    %c0_i32_0 = arith.constant 0 : i32
    %c0_i32_1 = arith.constant 0 : i32
    %c0_i32_2 = arith.constant 0 : i32
    return %c0_i32, %c0_i32_0, %c0_i32_1 : i32, i32, i32
  }
  func.func @transform_6(%arg0: i32) -> (i32, i32) {
    %c0_i32 = arith.constant 0 : i32
    %c0_i32_0 = arith.constant 0 : i32
    %c0_i32_1 = arith.constant 0 : i32
    return %c0_i32, %c0_i32_0 : i32, i32
  }
  func.func @transform_7(%arg0: i32) -> (i32, i32, i32) {
    %c0_i32 = arith.constant 0 : i32
    %c0_i32_0 = arith.constant 0 : i32
    %c0_i32_1 = arith.constant 0 : i32
    %c0_i32_2 = arith.constant 0 : i32
    return %c0_i32, %c0_i32_0, %c0_i32_1 : i32, i32, i32
  }
  func.func @transform_8(%arg0: i32) -> (i32, i32) {
    %c0_i32 = arith.constant 0 : i32
    %c0_i32_0 = arith.constant 0 : i32
    %c0_i32_1 = arith.constant 0 : i32
    return %c0_i32, %c0_i32_0 : i32, i32
  }
  func.func @transform_9(%arg0: i32) -> (i32, i32) {
    %c0_i32 = arith.constant 0 : i32
    %c0_i32_0 = arith.constant 0 : i32
    %c0_i32_1 = arith.constant 0 : i32
    return %c0_i32, %c0_i32_0 : i32, i32
  }
  func.func @transform_10(%arg0: i32) -> (i32, i32) {
    %c0_i32 = arith.constant 0 : i32
    %c0_i32_0 = arith.constant 0 : i32
    %c0_i32_1 = arith.constant 0 : i32
    return %c0_i32, %c0_i32_0 : i32, i32
  }
  func.func @transform_11(%arg0: i32) -> (i32, i32) {
    %c0_i32 = arith.constant 0 : i32
    %c0_i32_0 = arith.constant 0 : i32
    %c0_i32_1 = arith.constant 0 : i32
    return %c0_i32, %c0_i32_0 : i32, i32
  }
  func.func @transform_12(%arg0: i32) -> (i32, i32, i32) {
    %c0_i32 = arith.constant 0 : i32
    %c0_i32_0 = arith.constant 0 : i32
    %c0_i32_1 = arith.constant 0 : i32
    return %arg0, %c0_i32, %c0_i32_0 : i32, i32, i32
  }
}

</mosaic_0001>

<bundles_post_ra>
// kernel: vision_network_forward.1
= control target key start
LH: loop header
LB: loop body
LE: loop exit
PB: predicated region body
PF: predicated region fallthrough
CT: control target
= control target key end

     0   :  { %17 = vsyncpa [#allocation5], 0  ;;  %s4671_s0 = inlined_call_operand.vmem [shape: bf16[2,56,432], index: 0, kind: input, shape index: {}]   ;;  %s4672_s1 = inlined_call_operand.vmem [shape: bf16[432,128], index: 1, kind: input, shape index: {}]   ;;  %s4673_s2 = inlined_call_operand.vmem [shape: f32[1,128], index: 2, kind: input, shape index: {}]   ;;  %s4674_s3 = inlined_call_operand.vmem [shape: bf16[4,128,64], index: 3, kind: input, shape index: {}]   ;;  %s4675_s4 = inlined_call_operand.vmem [shape: f32[1,64], index: 4, kind: input, shape index: {}]   ;;  %s4676_s5 = inlined_call_operand.vmem [shape: bf16[9,64,64], index: 5, kind: input, shape index: {}]   ;;  %s4677_s6 = inlined_call_operand.vmem [shape: f32[1,64], index: 6, kind: input, shape index: {}]   ;;  %s4678_s7 = inlined_call_operand.vmem [shape: f32[3,32,64], index: 7, kind: input, shape index: {}]   ;;  %s4679_s8 = inlined_call_operand.vmem [shape: bf16[128,512], index: 8, kind: input, shape index: {}]   ;;  %s4680_s9 = inlined_call_operand.vmem [shape: f32[1,512], index: 9, kind: input, shape index: {}]   ;;  %s4681_s10 = inlined_call_operand.vmem [shape: bf16[512,32], index: 10, kind: input, shape index: {}]   ;;  %s4682_s11 = inlined_call_operand.vmem [shape: f32[1,32], index: 11, kind: input, shape index: {}]   ;;  %s4683_s12 = inlined_call_operand.hbm [shape: f32[2,1,32], index: 12, kind: output, shape index: {}]  }
   0x1   :  { %19 = vsyncpa [#allocation5 + $0x1], 0  ;;  %s3850_s21 = smov 0   ;;  %s3852_s22 = smov 0  }
   0x2   :  { %s3854_s23 = smov 0   ;;  %s3856_s24 = smov 0  }
   0x3 LB: > { %4687 = sst [smem:[#allocation7_spill]] %s3778_s23  ;;  %s3871_s25 = sadd.s32 4294967295, %s3782_s24   ;;  %s3782_s24 = sphi %s3856_s24, %s4692_s24   ;;  %s3778_s23 = sphi %s3854_s23, %s4694_s23   ;;  %s3774_s22 = sphi %s3852_s22, %s4696_s22   ;;  %s3770_s21 = sphi %s3850_s21, %s4695_s21  }
   0x4   : > { %s2662_s26 = sadd.s32 4294967294, %s3782_s24   ;;  %s3875_s27 = sadd.s32 1, %s3782_s24  }
   0x5   : > { %4688 = sst [smem:[#allocation8_spill]] %s3875_s27  ;;  %s289_s28 = sadd.s32 1, %s3778_s23 }
   0x6   : > { %s286_s29 = ssub.s32 %s3782_s24, %s3875_s27  ;;  %p299_p0 = scmp.ne.s32.totalorder %s3778_s23, %s3774_s22 }
   0x7   : > { %p287_p1 = scmp.eq.s32.totalorder %s286_s29, 0  ;;  %p300_p2 = scmp.eq.s32.totalorder %s3871_s25, 1 }
   0x8   : > { %p305_p3 = scmp.ne.s32.totalorder %s3774_s22, %s3770_s21  ;;  %p306_p4 = scmp.eq.s32.totalorder %s2662_s26, 1 }
   0x9   : > { %s3886_s30 = scalar_select %p287_p1, %s3778_s23, %s289_s28  }
   0xa   : > { %p3888_p5 = por %p300_p2, %p299_p0  ;;  %p3892_p6 = por %p306_p4, %p305_p3 }
   0xb   : > { %4689 = sst [smem:[#allocation9_spill]] %s3886_s30  ;;  %p2665_p7 = scmp.ge.s32.totalorder %s3782_s24, 1 }
   0xc   : > { %p365_p8 = scmp.lt.s32.totalorder %s3782_s24, 3 }
   0xe   : > { %p366_p9 = pnand %p2665_p7, %p365_p8 }
   0xf   : > { %p406_p10 = scmp.lt.s32.totalorder (!%p366_p9), %s3871_s25, 1  ;;  %s404_s28 = sand.u32 (!%p366_p9), 1, %s3774_s22  }
  0x10   : > { %369 = sbr.rel (%p366_p9) target bundleno = 1077 (0x435), region = 68  ;;  %s405_s30 = scalar_lea.vmem (!%p366_p9), [#allocation4], %s404_s28 }
  0x11   : > { %s2605_s17 = sshll.u32 (!%p366_p9), %s405_s30, 4  ;;  %s2595_s18 = scalar_lea.sflag (!%p366_p9), [#allocation5], %s404_s28  ;;  %s2606_s17 = int_to_ptr.vmem [resolvable:$true] %s2605_s17 }
  0x15   : > { %v3514_v0 = vld [vmem:[%s4672_s1 + $0x38] sm:$0xff]  ;;  %v3513_v3 = vld [vmem:[%s4672_s1 + $0x30] sm:$0xff]  ;;  %s407_s16 = scalar_select %p406_p10, %s3871_s25, 1  ;;  %v3512_v7 = vld [vmem:[%s4672_s1 + $0x28] sm:$0xff]  ;;  %vm716_vm0 = vcmask 392192   ;;  %vm1300_vm1 = vcmask 523264  }
  0x16   : > { %v3522_v1 = vld [vmem:[%s4672_s1 + $0x78] sm:$0xff]  ;;  %729 = vmatpush.bf16.msra.mxu0 %v3514_v0  ;;  %v3521_v4 = vld [vmem:[%s4672_s1 + $0x70] sm:$0xff]  ;;  %v3520_v8 = vld [vmem:[%s4672_s1 + $0x68] sm:$0xff]  ;;  %vm2592_vm2 = vcmask 253952  }
  0x17   : > { %v3530_v2 = vld [vmem:[%s4672_s1 + $0xb8] sm:$0xff]  ;;  %757 = vmatpush.bf16.msra.mxu1 %v3522_v1  ;;  %v3529_v5 = vld [vmem:[%s4672_s1 + $0xb0] sm:$0xff]  ;;  %s3666_s20 = smul.u32 112, %s407_s16  ;;  %v3528_v9 = vld [vmem:[%s4672_s1 + $0xa8] sm:$0xff] }
  0x18   : > { %785 = vmatpush.bf16.msra.mxu2 %v3530_v2  ;;  %v3533_v6 = vld [vmem:[%s4672_s1 + $0xd0] sm:$0xff]  ;;  %v3532_v10 = vld [vmem:[%s4672_s1 + $0xc8] sm:$0xff]  ;;  %v3511_v11 = vld [vmem:[%s4672_s1 + $0x20] sm:$0xff] }
  0x19   : > { %818 = vmatpush.bf16.msra.mxu3 %v3533_v6  ;;  %s3936_s19 = scalar_lea.vmem %s4671_s0, %s3666_s20  ;;  %v3519_v12 = vld [vmem:[%s4672_s1 + $0x60] sm:$0xff]  ;;  %v3510_v17 = vld [vmem:[%s4672_s1 + $0x18] sm:$0xff]  ;;  %v3509_v21 = vld [vmem:[%s4672_s1 + $0x10] sm:$0xff]  ;;  %s2603_s20 = scalar_lea.hbm %s4683_s12, %s3871_s25 }
  0x1a   : > { %730 = vmatpush.bf16.msra.mxu0 %v3513_v3  ;;  %v3527_v13 = vld [vmem:[%s4672_s1 + $0xa0] sm:$0xff]  ;;  %v3496_v15 = vld [vmem:[%s3936_s19 + $0xc] sm:$0xf]  ;;  %v2679_v16 = vld [vmem:[%s3936_s19 + $0x18] sm:$0xf0]  ;;  %s2607_s16 = sshll.u32 %s2603_s20, 4  ;;  %s2608_s16 = int_to_ptr.hbm [resolvable:$true] %s2607_s16 }
  0x1b   : > { %758 = vmatpush.bf16.msra.mxu1 %v3521_v4  ;;  %v3531_v14 = vld [vmem:[%s4672_s1 + $0xc0] sm:$0xff]  ;;  %v3518_v18 = vld [vmem:[%s4672_s1 + $0x58] sm:$0xff]  ;;  %v2682_v20 = vor.u32 %v3496_v15, %v2679_v16  ;;  %v3517_v22 = vld [vmem:[%s4672_s1 + $0x50] sm:$0xff]  ;;  %s3734_s23 = sshra.s32 %s2608_s16, 4  ;;  %s3735_s23 = int_to_ptr.hbm [resolvable:$true] %s3734_s23 }
  0x1c   : > { %786 = vmatpush.bf16.msra.mxu2 %v3529_v5  ;;  %v3526_v19 = vld [vmem:[%s4672_s1 + $0x98] sm:$0xff]  ;;  %v3525_v23 = vld [vmem:[%s4672_s1 + $0x90] sm:$0xff]  ;;  %v3508_v24 = vld [vmem:[%s4672_s1 + $0x8] sm:$0xff]  ;;  %s3736_s26 = scalar_lea.hbm %s3735_s23, 1  ;;  %p3741_p0 = scmp.lt.s32.totalorder %s3735_s23, %s4683_s12 }
  0x1d   : > { %819 = vmatpush.bf16.msra.mxu3 %v3532_v10  ;;  %v3516_v25 = vld [vmem:[%s4672_s1 + $0x48] sm:$0xff]  ;;  %v3507_v27 = vld [vmem:[%s4672_s1] sm:$0xff]  ;;  %v3497_v30 = vld [vmem:[%s3936_s19 + $0xc] sm:$0xf0]  ;;  %p3737_p11 = scmp.ne.s32.totalorder %s3735_s23, %s3736_s26 }
  0x1e   : > { %731 = vmatpush.bf16.msra.mxu0 %v3512_v7  ;;  %v3524_v26 = vld [vmem:[%s4672_s1 + $0x88] sm:$0xff]  ;;  %v3515_v28 = vld [vmem:[%s4672_s1 + $0x40] sm:$0xff]  ;;  %v2671_v32 = vld [vmem:[%s3936_s19 + $0x10] sm:$0xf0] }
  0x1f   : > { %759 = vmatpush.bf16.msra.mxu1 %v3520_v8  ;;  %v2669_v29 = vld [vmem:[%s3936_s19] sm:$0xf]  ;;  %v3495_v31 = vld [vmem:[%s3936_s19 + $0x4] sm:$0xf]  ;;  %v2677_v34 = vld [vmem:[%s3936_s19 + $0x8] sm:$0xf]  ;;  %p3738_p12 = pnand %p3737_p11, %p3888_p5 }
  0x20   : > { %787 = vmatpush.bf16.msra.mxu2 %v3528_v9  ;;  %v3523_v33 = vld [vmem:[%s4672_s1 + $0x80] sm:$0xff]  ;;  %v3498_v35 = vld [vmem:[%s3936_s19 + $0x14] sm:$0xf0]  ;;  %v3500_v36 = vld [vmem:[%s3936_s19 + $0x2c] sm:$0xf]  ;;  %v2670_v38 = vor.u32 %v3497_v30, %v2669_v29  ;;  %v2674_v39 = vor.u32 %v3495_v31, %v2671_v32 }
  0x21   : > { %820 = vmatpush.bf16.msra.mxu3 %v3531_v14  ;;  %v2695_v37 = vld [vmem:[%s3936_s19 + $0x38] sm:$0xf0]  ;;  %v2678_v40 = vor.u32 %v3498_v35, %v2677_v34  ;;  %v2685_v42 = vld [vmem:[%s3936_s19 + $0x20] sm:$0xf]  ;;  %v3501_v43 = vld [vmem:[%s3936_s19 + $0x2c] sm:$0xf0]  ;;  %p3739_p13 = pneg %p3738_p12 }
  0x22   : > { %732 = vmatpush.bf16.msra.mxu0 %v3511_v11  ;;  %v2698_v41 = vor.u32 %v3500_v36, %v2695_v37  ;;  %v3499_v44 = vld [vmem:[%s3936_s19 + $0x24] sm:$0xf]  ;;  %v2687_v45 = vld [vmem:[%s3936_s19 + $0x30] sm:$0xf0]  ;;  %v2693_v46 = vld [vmem:[%s3936_s19 + $0x28] sm:$0xf]  ;;  %v2686_v50 = vor.u32 %v3501_v43, %v2685_v42 }
  0x23   : > { %760 = vmatpush.bf16.msra.mxu1 %v3519_v12  ;;  %v3502_v47 = vld [vmem:[%s3936_s19 + $0x34] sm:$0xf0]  ;;  %v3504_v48 = vld [vmem:[%s3936_s19 + $0x4c] sm:$0xf]  ;;  %v2711_v49 = vld [vmem:[%s3936_s19 + $0x58] sm:$0xf0]  ;;  %v2690_v51 = vor.u32 %v3499_v44, %v2687_v45 }
  0x24   : > { %788 = vmatpush.bf16.msra.mxu2 %v3527_v13  ;;  %2823 = vmatmul.msk.bf16.vlgmr.msra.gmra.mxu3 %vm716_vm0, %v2682_v20  ;;  %v2694_v52 = vor.u32 %v3502_v47, %v2693_v46  ;;  %v2714_v53 = vor.u32 %v3504_v48, %v2711_v49  ;;  %v3549_v54 = vld [vmem:[%s4674_s3 + $0x78] sm:$0xff]  ;;  %v3548_v58 = vld [vmem:[%s4674_s3 + $0x70] sm:$0xff]  ;;  %v425_v62 = vld [vmem:[%s3936_s19 + $0x68] sm:$0xff] }
  0x25   : > { %v3565_v55 = vld [vmem:[%s4674_s3 + $0xf8] sm:$0xff]  ;;  %968 = vmatpush.bf16.msrb.mxu3 %v3549_v54  ;;  %v3564_v59 = vld [vmem:[%s4674_s3 + $0xf0] sm:$0xff]  ;;  %v3547_v63 = vld [vmem:[%s4674_s3 + $0x68] sm:$0xff]  ;;  %v525_v7 = vunpack.c.h.b16 %v425_v62  ;;  %v524_v15 = vunpack.c.l.b16 %v425_v62 }
  0x26   : > { %733 = vmatpush.bf16.msra.mxu0 %v3510_v17  ;;  %v3541_v56 = vld [vmem:[%s4674_s3 + $0x38] sm:$0xff]  ;;  %v3540_v60 = vld [vmem:[%s4674_s3 + $0x30] sm:$0xff]  ;;  %v3563_v0 = vld [vmem:[%s4674_s3 + $0xe8] sm:$0xff] }
  0x27   : > { %761 = vmatpush.bf16.msra.mxu1 %v3518_v18  ;;  %v3557_v57 = vld [vmem:[%s4674_s3 + $0xb8] sm:$0xff]  ;;  %v3556_v61 = vld [vmem:[%s4674_s3 + $0xb0] sm:$0xff]  ;;  %v2701_v1 = vld [vmem:[%s3936_s19 + $0x40] sm:$0xf]  ;;  %v541_v11 = vpack.c.b16 %v525_v7, %v525_v7  ;;  %v540_v18 = vpack.c.b16 %v524_v15, %v524_v15 }
  0x28   : > { %789 = vmatpush.bf16.msra.mxu2 %v3526_v19  ;;  %v3505_v2 = vld [vmem:[%s3936_s19 + $0x4c] sm:$0xf0]  ;;  %v3503_v3 = vld [vmem:[%s3936_s19 + $0x44] sm:$0xf]  ;;  %v2703_v4 = vld [vmem:[%s3936_s19 + $0x50] sm:$0xf0] }
  0x29   : > { %969 = vmatpush.bf16.msrb.mxu3 %v3548_v58  ;;  %v2709_v5 = vld [vmem:[%s3936_s19 + $0x48] sm:$0xf]  ;;  %v3506_v6 = vld [vmem:[%s3936_s19 + $0x54] sm:$0xf0]  ;;  %v2702_v8 = vor.u32 %v3505_v2, %v2701_v1  ;;  %v2706_v9 = vor.u32 %v3503_v3, %v2703_v4  ;;  %v424_v12 = vld [vmem:[%s3936_s19 + $0x60] sm:$0xff]  ;;  %s3784_s19 = smov 64  }
  0x2a   : > { %734 = vmatpush.bf16.msra.mxu0 %v3509_v21  ;;  %v2710_v10 = vor.u32 %v3506_v6, %v2709_v5  ;;  %v522_v13 = vunpack.c.l.b16 %v424_v12  ;;  %v523_v14 = vunpack.c.h.b16 %v424_v12  ;;  %v3539_v19 = vld [vmem:[%s4674_s3 + $0x28] sm:$0xff]  ;;  %v3546_v20 = vld [vmem:[%s4674_s3 + $0x60] sm:$0xff]  ;;  %v3560_v30 = vld [vmem:[%s4674_s3 + $0xd0] sm:$0xff] }
  0x2b   : > { %762 = vmatpush.bf16.msra.mxu1 %v3517_v22  ;;  %v3555_v21 = vld [vmem:[%s4674_s3 + $0xa8] sm:$0xff]  ;;  %v3538_v22 = vld [vmem:[%s4674_s3 + $0x20] sm:$0xff]  ;;  %v3553_v34 = vld [vmem:[%s4674_s3 + $0x98] sm:$0xff] }
  0x2c   : > { %790 = vmatpush.bf16.msra.mxu2 %v3525_v23  ;;  %v538_v16 = vpack.c.b16 %v522_v13, %v522_v13  ;;  %v539_v17 = vpack.c.b16 %v523_v14, %v523_v14  ;;  %v3537_v23 = vld [vmem:[%s4674_s3 + $0x18] sm:$0xff]  ;;  %v3535_v29 = vld [vmem:[%s4674_s3 + $0x8] sm:$0xff]  ;;  %v3534_v31 = vld [vmem:[%s4674_s3] sm:$0xff] }
  0x2d   : > { %970 = vmatpush.bf16.msrb.mxu3 %v3547_v63  ;;  %v3559_v35 = vld [vmem:[%s4674_s3 + $0xc8] sm:$0xff]  ;;  %v4097_v36 = vld [vmem:[%s4673_s2] ss:$0 sm:$0xff]  ;;  %v3552_v37 = vld [vmem:[%s4674_s3 + $0x90] sm:$0xff] }
  0x2e   : > { %735 = vmatpush.bf16.msra.mxu0 %v3508_v24  ;;  %v3562_v24 = vld [vmem:[%s4674_s3 + $0xe0] sm:$0xff]  ;;  %v3543_v43 = vld [vmem:[%s4674_s3 + $0x48] sm:$0xff] }
  0x2f   : > { %763 = vmatpush.bf16.msra.mxu1 %v3516_v25  ;;  %v3536_v25 = vld [vmem:[%s4674_s3 + $0x10] sm:$0xff]  ;;  %v3551_v44 = vld [vmem:[%s4674_s3 + $0x88] sm:$0xff]  ;;  %v3542_v47 = vld [vmem:[%s4674_s3 + $0x40] sm:$0xff] }
  0x30   : > { %791 = vmatpush.bf16.msra.mxu2 %v3524_v26  ;;  %v3545_v26 = vld [vmem:[%s4674_s3 + $0x58] sm:$0xff]  ;;  %v3550_v48 = vld [vmem:[%s4674_s3 + $0x80] sm:$0xff] }
  0x31   : > { %971 = vmatpush.bf16.msrb.mxu3 %v3546_v20 }
  0x32   : > { %736 = vmatpush.bf16.msra.mxu0 %v3507_v27  ;;  %v3554_v27 = vld [vmem:[%s4674_s3 + $0xa0] sm:$0xff] }
  0x33   : > { %764 = vmatpush.bf16.msra.mxu1 %v3515_v28  ;;  %v3561_v28 = vld [vmem:[%s4674_s3 + $0xd8] sm:$0xff] }
  0x34   : > { %792 = vmatpush.bf16.msra.mxu2 %v3523_v33  ;;  %2824 = vmatmul.msk.bf16.gmra.mxu3 %vm716_vm0, %v2698_v41  ;;  %v3544_v33 = vld [vmem:[%s4674_s3 + $0x50] sm:$0xff] }
  0x35   : > { %737 = vmatmul.bf16.vlgmr.msra.gmra.mxu0 %v2670_v38  ;;  %972 = vmatpush.bf16.msrb.mxu3 %v3545_v26  ;;  %v3558_v38 = vld [vmem:[%s4674_s3 + $0xc0] sm:$0xff] }
  0x36   : > { %765 = vmatmul.bf16.vlgmr.msra.gmra.mxu1 %v2674_v39  ;;  %1040 = vmatpush.bf16.msrb.mxu0 %v3541_v56 }
  0x37   : > { %793 = vmatmul.bf16.vlgmr.msra.gmra.mxu2 %v2678_v40  ;;  %1138 = vmatpush.bf16.msrb.mxu1 %v3557_v57 }
  0x38   : > { %1242 = vmatpush.bf16.msrb.mxu2 %v3565_v55 }
  0x39   : > { %973 = vmatpush.bf16.msrb.mxu3 %v3544_v33 }
  0x3a   : > { %1041 = vmatpush.bf16.msrb.mxu0 %v3540_v60 }
  0x3b   : > { %1139 = vmatpush.bf16.msrb.mxu1 %v3556_v61 }
  0x3c   : > { %1243 = vmatpush.bf16.msrb.mxu2 %v3564_v59 }
  0x3d   : > { %974 = vmatpush.bf16.msrb.mxu3 %v3543_v43 }
  0x3e   : > { %1042 = vmatpush.bf16.msrb.mxu0 %v3539_v19 }
  0x3f   : > { %1140 = vmatpush.bf16.msrb.mxu1 %v3555_v21 }
  0x40   : > { %1244 = vmatpush.bf16.msrb.mxu2 %v3563_v0 }
  0x41   : > { %975 = vmatpush.bf16.msrb.mxu3 %v3542_v47 }
  0x42   : > { %1043 = vmatpush.bf16.msrb.mxu0 %v3538_v22 }
  0x43   : > { %1141 = vmatpush.bf16.msrb.mxu1 %v3554_v27 }
  0x44   : > { %2825 = vmatmul.msk.bf16.gmra.mxu3 %vm716_vm0, %v2714_v53  ;;  %1245 = vmatpush.bf16.msrb.mxu2 %v3562_v24 }
  0x45   : > { %742 = vmatmul.bf16.gmra.mxu0 %v2686_v50 }
  0x46   : > { %770 = vmatmul.bf16.gmra.mxu1 %v2690_v51  ;;  %1044 = vmatpush.bf16.msrb.mxu0 %v3537_v23 }
  0x47   : > { %798 = vmatmul.bf16.gmra.mxu2 %v2694_v52  ;;  %1142 = vmatpush.bf16.msrb.mxu1 %v3553_v34 }
  0x48   : > { %1246 = vmatpush.bf16.msrb.mxu2 %v3561_v28 }
  0x4a   : > { %1045 = vmatpush.bf16.msrb.mxu0 %v3536_v25 }
  0x4b   : > { %1143 = vmatpush.bf16.msrb.mxu1 %v3552_v37 }
  0x4c   : > { %1247 = vmatpush.bf16.msrb.mxu2 %v3560_v30 }
  0x4e   : > { %1046 = vmatpush.bf16.msrb.mxu0 %v3535_v29 }
  0x4f   : > { %1144 = vmatpush.bf16.msrb.mxu1 %v3551_v44 }
  0x50   : > { %1248 = vmatpush.bf16.msrb.mxu2 %v3559_v35 }
  0x52   : > { %1047 = vmatpush.bf16.msrb.mxu0 %v3534_v31 }
  0x53   : > { %1145 = vmatpush.bf16.msrb.mxu1 %v3550_v48 }
  0x54   : > { %2826 = vmatmul.msk.bf16.gmra.mxu3 %vm716_vm0, %v541_v11  ;;  %1249 = vmatpush.bf16.msrb.mxu2 %v3558_v38 }
  0x55   : > { %747 = vmatmul.bf16.gmra.mxu0 %v2702_v8 }
  0x56   : > { %775 = vmatmul.bf16.gmra.mxu1 %v2706_v9 }
  0x57   : > { %803 = vmatmul.bf16.gmra.mxu2 %v2710_v10 }
  0x65   : > { %752 = vmatmul.bf16.gmra.mxu0 %v538_v16 }
  0x66   : > { %780 = vmatmul.bf16.gmra.mxu1 %v539_v17 }
  0x67   : > { %808 = vmatmul.bf16.gmra.mxu2 %v540_v18 }
  0xa7   : > { %v822_v32 = vpop.f32.mrf.mxu3 }
  0xaf   : > { %v824_v42 = vpop.f32.mrf.mxu3 }
  0xb2   : > { %v738_v39 = vpop.f32.mrf.mxu0 }
  0xb3   : > { %v766_v40 = vpop.f32.mrf.mxu1  ;;  %v739_v41 = vadd.f32 %v4097_v36, %v738_v39 }
  0xb5   : > { %v767_v45 = vadd.f32 %v766_v40, %v739_v41 }
  0xb7   : > { %v827_v52 = vpop.f32.mrf.mxu3 }
  0xba   : > { %v794_v46 = vpop.f32.mrf.mxu2  ;;  %v740_v50 = vpop.f32.mrf.mxu0 }
  0xbb   : > { %v795_v49 = vadd.f32 %v794_v46, %v767_v45  ;;  %v768_v51 = vpop.f32.mrf.mxu1  ;;  %v741_v54 = vadd.f32 %v4097_v36, %v740_v50 }
  0xbd   : > { %v823_v53 = vadd.f32 %v822_v32, %v795_v49  ;;  %v769_v57 = vadd.f32 %v768_v51, %v741_v54 }
  0xbf   : > { %v841_v55 = vmax.f32 %v823_v53, 0.0  ;;  %v829_v0 = vpop.f32.mrf.mxu3 }
  0xc1   : > { %v848_v56 = vpack.c.bf16 %v841_v55, %v841_v55 }
  0xc2   : > { %v796_v58 = vpop.f32.mrf.mxu2  ;;  %v743_v61 = vpop.f32.mrf.mxu0 }
  0xc3   : > { %v855_v59 = vunpack.c.l.bf16 %v848_v56  ;;  %v797_v60 = vadd.f32 %v796_v58, %v769_v57  ;;  %v771_v62 = vpop.f32.mrf.mxu1  ;;  %v744_v63 = vadd.f32 %v4097_v36, %v743_v61 }
  0xc5   : > { %862 = vst [vmem:[#allocation2] sm:$0xff] %v855_v59  ;;  %v825_v1 = vadd.f32 %v824_v42, %v797_v60  ;;  %v772_v3 = vadd.f32 %v771_v62, %v744_v63 }
  0xc7   : > { %v842_v2 = vmax.f32 %v825_v1, 0.0  ;;  %v832_v10 = vpop.f32.mrf.mxu3 }
  0xc9   : > { %v849_v4 = vpack.c.bf16 %v842_v2, %v842_v2 }
  0xca   : > { %v799_v5 = vpop.f32.mrf.mxu2  ;;  %v745_v8 = vpop.f32.mrf.mxu0 }
  0xcb   : > { %v856_v6 = vunpack.c.l.bf16 %v849_v4  ;;  %v800_v7 = vadd.f32 %v799_v5, %v772_v3  ;;  %v773_v9 = vpop.f32.mrf.mxu1  ;;  %v746_v12 = vadd.f32 %v4097_v36, %v745_v8 }
  0xcd   : > { %863 = vst [vmem:[#allocation2 + $0x8] sm:$0xff] %v856_v6  ;;  %v828_v11 = vadd.f32 %v827_v52, %v800_v7  ;;  %v875_v13 = vpack.c.bf16 %v856_v6, %v855_v59  ;;  %v774_v16 = vadd.f32 %v773_v9, %v746_v12 }
  0xcf   : > { %v843_v14 = vmax.f32 %v828_v11, 0.0  ;;  %1048 = vmatmul.bf16.vlgmr.msrb.gmra.mxu0 %v875_v13  ;;  %v834_v23 = vpop.f32.mrf.mxu3 }
  0xd1   : > { %v850_v15 = vpack.c.bf16 %v843_v14, %v843_v14 }
  0xd2   : > { %v801_v17 = vpop.f32.mrf.mxu2  ;;  %v748_v20 = vpop.f32.mrf.mxu0 }
  0xd3   : > { %v857_v18 = vunpack.c.l.bf16 %v850_v15  ;;  %v802_v19 = vadd.f32 %v801_v17, %v774_v16  ;;  %v776_v21 = vpop.f32.mrf.mxu1  ;;  %v749_v22 = vadd.f32 %v4097_v36, %v748_v20  ;;  %v3572_v20 = vld [vmem:[%s4676_s5 + $0x30] sm:$0xff] }
  0xd4   : > { %v894_v34 = vld [vmem:[#allocation2 + $0x1] sm:$0xff] }
  0xd5   : > { %864 = vst [vmem:[#allocation2 + $0x10] sm:$0xff] %v857_v18  ;;  %v830_v24 = vadd.f32 %v829_v0, %v802_v19  ;;  %v1174_v25 = vpack.c.bf16 %v857_v18, %v856_v6  ;;  %v777_v27 = vadd.f32 %v776_v21, %v749_v22  ;;  %v1064_v38 = vld [vmem:[#allocation2 + $0x7] sm:$0xff]  ;;  %v3573_v19 = vld [vmem:[%s4676_s5 + $0x38] sm:$0xff]  ;;  %v3568_v22 = vld [vmem:[%s4676_s5 + $0x10] sm:$0xff] }
  0xd6   : > { %1370 = vmatpush.bf16.msra.mxu3 %v3573_v19  ;;  %v3569_v21 = vld [vmem:[%s4676_s5 + $0x18] sm:$0xff]  ;;  %v3596_v19 = vld [vmem:[%s4676_s5 + $0xf0] sm:$0xff] }
  0xd7   : > { %v844_v26 = vmax.f32 %v830_v24, 0.0  ;;  %1250 = vmatmul.bf16.vlgmr.msrb.gmra.mxu2 %v1174_v25  ;;  %v837_v40 = vpop.f32.mrf.mxu3  ;;  %1419 = vmatpush.bf16.msra.mxu0 %v3569_v21  ;;  %v3581_v24 = vld [vmem:[%s4676_s5 + $0x78] sm:$0xff]  ;;  %v3567_v25 = vld [vmem:[%s4676_s5 + $0x8] sm:$0xff] }
  0xd8   : > { %1551 = vmatpush.bf16.msra.mxu2 %v3581_v24 }
  0xd9   : > { %v851_v28 = vpack.c.bf16 %v844_v26, %v844_v26  ;;  %v3577_v26 = vld [vmem:[%s4676_s5 + $0x58] sm:$0xff] }
  0xda   : > { %v804_v29 = vpop.f32.mrf.mxu2  ;;  %v750_v32 = vpop.f32.mrf.mxu0  ;;  %1371 = vmatpush.bf16.msra.mxu3 %v3572_v20  ;;  %1483 = vmatpush.bf16.msra.mxu1 %v3577_v26 }
  0xdb   : > { %v858_v30 = vunpack.c.l.bf16 %v851_v28  ;;  %v805_v31 = vadd.f32 %v804_v29, %v777_v27  ;;  %v778_v33 = vpop.f32.mrf.mxu1  ;;  %v751_v35 = vadd.f32 %v4097_v36, %v750_v32  ;;  %1420 = vmatpush.bf16.msra.mxu0 %v3568_v22  ;;  %v3566_v29 = vld [vmem:[%s4676_s5] sm:$0xff]  ;;  %v3571_v32 = vld [vmem:[%s4676_s5 + $0x28] sm:$0xff] }
  0xdc   : > { %v895_v37 = vld [vmem:[#allocation2 + $0x9] sm:$0xff] }
  0xdd   : > { %v1065_v39 = vld [vmem:[#allocation2 + $0xf] sm:$0xff]  ;;  %865 = vst [vmem:[#allocation2 + $0x18] sm:$0xff] %v858_v30  ;;  %v833_v41 = vadd.f32 %v832_v10, %v805_v31  ;;  %v900_v42 = vpack.c.bf16 %v895_v37, %v894_v34  ;;  %v876_v44 = vpack.c.bf16 %v858_v30, %v857_v18  ;;  %v779_v47 = vadd.f32 %v778_v33, %v751_v35 }
  0xde   : > { %v1070_v43 = vpack.c.bf16 %v1065_v39, %v1064_v38  ;;  %v3580_v31 = vld [vmem:[%s4676_s5 + $0x70] sm:$0xff]  ;;  %1372 = vmatpush.bf16.msra.mxu3 %v3571_v32  ;;  %v3575_v37 = vld [vmem:[%s4676_s5 + $0x48] sm:$0xff]  ;;  %v3582_v32 = vld [vmem:[%s4676_s5 + $0x80] sm:$0xff] }
  0xdf   : > { %v845_v45 = vmax.f32 %v833_v41, 0.0  ;;  %976 = vmatmul.bf16.vlgmr.msrb.gmra.mxu3 %v900_v42  ;;  %1053 = vmatmul.bf16.gmra.mxu0 %v876_v44  ;;  %v839_v54 = vpop.f32.mrf.mxu3  ;;  %v3579_v38 = vld [vmem:[%s4676_s5 + $0x68] sm:$0xff]  ;;  %v4166_v41 = vld [vmem:[%s4675_s4] ss:$0 sm:$0xff] }
  0xe0   : > { %1146 = vmatmul.bf16.vlgmr.msrb.gmra.mxu1 %v1070_v43  ;;  %1421 = vmatpush.bf16.msra.mxu0 %v3567_v25  ;;  %v3570_v44 = vld [vmem:[%s4676_s5 + $0x20] sm:$0xff]  ;;  %v3583_v22 = vld [vmem:[%s4676_s5 + $0x88] sm:$0xff] }
  0xe1   : > { %v852_v46 = vpack.c.bf16 %v845_v45, %v845_v45  ;;  %1552 = vmatpush.bf16.msra.mxu2 %v3580_v31  ;;  %v3574_v45 = vld [vmem:[%s4676_s5 + $0x40] sm:$0xff] }
  0xe2   : > { %v806_v48 = vpop.f32.mrf.mxu2  ;;  %v753_v51 = vpop.f32.mrf.mxu0  ;;  %1373 = vmatpush.bf16.msra.mxu3 %v3570_v44 }
  0xe3   : > { %v859_v49 = vunpack.c.l.bf16 %v852_v46  ;;  %v807_v50 = vadd.f32 %v806_v48, %v779_v47  ;;  %v781_v52 = vpop.f32.mrf.mxu1  ;;  %v754_v53 = vadd.f32 %v4097_v36, %v753_v51  ;;  %v3578_v46 = vld [vmem:[%s4676_s5 + $0x60] sm:$0xff] }
  0xe4   : > { %v896_v1 = vld [vmem:[#allocation2 + $0x11] sm:$0xff]  ;;  %1422 = vmatpush.bf16.msra.mxu0 %v3566_v29 }
  0xe5   : > { %866 = vst [vmem:[#allocation2 + $0x20] sm:$0xff] %v859_v49  ;;  %v835_v55 = vadd.f32 %v834_v23, %v807_v50  ;;  %v1175_v56 = vpack.c.bf16 %v859_v49, %v858_v30  ;;  %v782_v58 = vadd.f32 %v781_v52, %v754_v53  ;;  %v1066_v3 = vld [vmem:[#allocation2 + $0x17] sm:$0xff]  ;;  %1553 = vmatpush.bf16.msra.mxu2 %v3579_v38 }
  0xe6   : > { %v3576_v30 = vld [vmem:[%s4676_s5 + $0x50] sm:$0xff] }
  0xe7   : > { %v846_v57 = vmax.f32 %v835_v55, 0.0  ;;  %1255 = vmatmul.bf16.gmra.mxu2 %v1175_v56  ;;  %1484 = vmatpush.bf16.msra.mxu1 %v3576_v30 }
  0xe9   : > { %v853_v59 = vpack.c.bf16 %v846_v57, %v846_v57  ;;  %1554 = vmatpush.bf16.msra.mxu2 %v3578_v46 }
  0xea   : > { %v809_v60 = vpop.f32.mrf.mxu2  ;;  %v755_v63 = vpop.f32.mrf.mxu0 }
  0xeb   : > { %v860_v61 = vunpack.c.l.bf16 %v853_v59  ;;  %v810_v62 = vadd.f32 %v809_v60, %v782_v58  ;;  %v783_v0 = vpop.f32.mrf.mxu1  ;;  %1485 = vmatpush.bf16.msra.mxu1 %v3575_v37 }
  0xec   : > { %v897_v2 = vld [vmem:[#allocation2 + $0x19] sm:$0xff] }
  0xed   : > { %v1067_v4 = vld [vmem:[#allocation2 + $0x1f] sm:$0xff]  ;;  %867 = vst [vmem:[#allocation2 + $0x28] sm:$0xff] %v860_v61  ;;  %v838_v5 = vadd.f32 %v837_v40, %v810_v62  ;;  %v901_v36 = vpack.c.bf16 %v897_v2, %v896_v1  ;;  %v877_v7 = vpack.c.bf16 %v860_v61, %v859_v49 }
  0xee   : > { %v1071_v6 = vpack.c.bf16 %v1067_v4, %v1066_v3  ;;  %v3589_v62 = vld [vmem:[%s4676_s5 + $0xb8] sm:$0xff]  ;;  %v3588_v4 = vld [vmem:[%s4676_s5 + $0xb0] sm:$0xff] }
  0xef   : > { %v847_v8 = vmax.f32 %v838_v5, 0.0  ;;  %981 = vmatmul.bf16.gmra.mxu3 %v901_v36  ;;  %1058 = vmatmul.bf16.gmra.mxu0 %v877_v7 }
  0xf0   : > { %1151 = vmatmul.bf16.gmra.mxu1 %v1071_v6  ;;  %1687 = vmatpush.bf16.msrb.mxu0 %v3589_v62  ;;  %v3585_v6 = vld [vmem:[%s4676_s5 + $0x98] sm:$0xff] }
  0xf1   : > { %v854_v9 = vpack.c.bf16 %v847_v8, %v847_v8  ;;  %1486 = vmatpush.bf16.msra.mxu1 %v3574_v45  ;;  %1619 = vmatpush.bf16.msrb.mxu3 %v3585_v6 }
  0xf2   : > { %v811_v10 = vpop.f32.mrf.mxu2 }
  0xf3   : > { %v861_v11 = vunpack.c.l.bf16 %v854_v9  ;;  %v3584_v9 = vld [vmem:[%s4676_s5 + $0x90] sm:$0xff] }
  0xf4   : > { %v898_v13 = vld [vmem:[#allocation2 + $0x21] sm:$0xff]  ;;  %1688 = vmatpush.bf16.msrb.mxu0 %v3588_v4 }
  0xf5   : > { %868 = vst [vmem:[#allocation2 + $0x30] sm:$0xff] %v861_v11  ;;  %v1176_v12 = vpack.c.bf16 %v861_v11, %v860_v61  ;;  %v1068_v15 = vld [vmem:[#allocation2 + $0x27] sm:$0xff]  ;;  %1620 = vmatpush.bf16.msrb.mxu3 %v3584_v9 }
  0xf7   : > { %1260 = vmatmul.bf16.gmra.mxu2 %v1176_v12  ;;  %v3587_v12 = vld [vmem:[%s4676_s5 + $0xa8] sm:$0xff] }
  0xf8   : > { %1689 = vmatpush.bf16.msrb.mxu0 %v3587_v12 }
  0xf9   : > { %1621 = vmatpush.bf16.msrb.mxu3 %v3583_v22 }
  0xfc   : > { %v899_v14 = vld [vmem:[#allocation2 + $0x29] sm:$0xff] }
  0xfd   : > { %v1069_v16 = vld [vmem:[#allocation2 + $0x2f] sm:$0xff]  ;;  %v902_v17 = vpack.c.bf16 %v899_v14, %v898_v13  ;;  %v3593_v13 = vld [vmem:[%s4676_s5 + $0xd8] sm:$0xff]  ;;  %1622 = vmatpush.bf16.msrb.mxu3 %v3582_v32 }
  0xfe   : > { %v1072_v18 = vpack.c.bf16 %v1069_v16, %v1068_v15  ;;  %v3597_v14 = vld [vmem:[%s4676_s5 + $0xf8] sm:$0xff]  ;;  %1755 = vmatpush.bf16.msrb.mxu1 %v3593_v13 }
  0xff   : > { %986 = vmatmul.bf16.gmra.mxu3 %v902_v17  ;;  %v3586_v17 = vld [vmem:[%s4676_s5 + $0xa0] sm:$0xff]  ;;  %1823 = vmatpush.bf16.msrb.mxu2 %v3597_v14 }
 0x100   : > { %1156 = vmatmul.bf16.gmra.mxu1 %v1072_v18  ;;  %v3592_v18 = vld [vmem:[%s4676_s5 + $0xd0] sm:$0xff]  ;;  %1690 = vmatpush.bf16.msrb.mxu0 %v3586_v17  ;;  %v3598_v17 = vld [vmem:[%s4676_s5 + $0x100] sm:$0xff] }
 0x102   : > { %1756 = vmatpush.bf16.msrb.mxu1 %v3592_v18 }
 0x103   : > { %1824 = vmatpush.bf16.msrb.mxu2 %v3596_v19 }
 0x14c   : > { %v1049_v23 = vpop.f32.mrf.mxu0 }
 0x154   : > { %v1051_v33 = vpop.f32.mrf.mxu0 }
 0x15a   : > { %v1251_v28 = vpop.f32.mrf.mxu2 }
 0x15c   : > { %v1054_v51 = vpop.f32.mrf.mxu0 }
 0x15d   : > { %v1147_v27 = vpop.f32.mrf.mxu1 }
 0x162   : > { %v977_v34 = vpop.f32.mrf.mxu3  ;;  %v1253_v42 = vpop.f32.mrf.mxu2 }
 0x163   : > { %v1050_v35 = vadd.f32 %v1049_v23, %v977_v34  ;;  %v3595_v34 = vld [vmem:[%s4676_s5 + $0xe8] sm:$0xff] }
 0x164   : > { %v1056_v1 = vpop.f32.mrf.mxu0  ;;  %1825 = vmatpush.bf16.msrb.mxu2 %v3595_v34 }
 0x165   : > { %v1149_v39 = vpop.f32.mrf.mxu1  ;;  %v1162_v40 = vadd.f32 %v1147_v27, %v1050_v35 }
 0x167   : > { %v1266_v43 = vadd.f32 %v1251_v28, %v1162_v40  ;;  %v3594_v40 = vld [vmem:[%s4676_s5 + $0xe0] sm:$0xff] }
 0x168   : > { %1826 = vmatpush.bf16.msrb.mxu2 %v3594_v40 }
 0x169   : > { %v1276_v47 = vadd.f32 %v4166_v41, %v1266_v43 }
 0x16a   : > { %v979_v48 = vpop.f32.mrf.mxu3  ;;  %v1256_v57 = vpop.f32.mrf.mxu2 }
 0x16b   : > { %v1282_v49 = vmax.f32 %v1276_v47, 0.0  ;;  %v1052_v50 = vadd.f32 %v1051_v33, %v979_v48  ;;  %v3591_v33 = vld [vmem:[%s4676_s5 + $0xc8] sm:$0xff] }
 0x16c   : > { %v1059_v23 = vpop.f32.mrf.mxu0  ;;  %1757 = vmatpush.bf16.msrb.mxu1 %v3591_v33 }
 0x16d   : > { %v1288_v52 = vpack.c.bf16 %v1282_v49, %v1282_v49  ;;  %v1163_v53 = vadd.f32 %v1149_v39, %v1052_v50  ;;  %v1152_v54 = vpop.f32.mrf.mxu1  ;;  %v3590_v39 = vld [vmem:[%s4676_s5 + $0xc0] sm:$0xff] }
 0x16f   : > { %v1294_v55 = vunpack.c.l.bf16 %v1288_v52  ;;  %v1267_v56 = vadd.f32 %v1253_v42, %v1163_v53 }
 0x170   : > { %1758 = vmatpush.bf16.msrb.mxu1 %v3590_v39 }
 0x171   : > { %1301 = vst.msk [vmem:[#allocation3] sm:$0xff] %vm1300_vm1, %v1294_v55  ;;  %v1277_v58 = vadd.f32 %v4166_v41, %v1267_v56 }
 0x172   : > { %v982_v59 = vpop.f32.mrf.mxu3  ;;  %v1258_v8 = vpop.f32.mrf.mxu2 }
 0x173   : > { %v1283_v60 = vmax.f32 %v1277_v58, 0.0  ;;  %v1055_v61 = vadd.f32 %v1054_v51, %v982_v59  ;;  %v3601_v59 = vld [vmem:[%s4676_s5 + $0x118] sm:$0xff] }
 0x175   : > { %v1289_v63 = vpack.c.bf16 %v1283_v60, %v1283_v60  ;;  %v1164_v0 = vadd.f32 %v1152_v54, %v1055_v61  ;;  %v1154_v5 = vpop.f32.mrf.mxu1  ;;  %v1061_v54 = vpop.f32.mrf.mxu0 }
 0x177   : > { %v1295_v2 = vunpack.c.l.bf16 %v1289_v63  ;;  %v1268_v3 = vadd.f32 %v1256_v57, %v1164_v0 }
 0x178   : > { %v1307_v24 = vld [vmem:[#allocation3] sm:$0xff] }
 0x179   : > { %1302 = vst.msk [vmem:[#allocation3 + $0x8] sm:$0xff] %vm1300_vm1, %v1295_v2  ;;  %v1278_v36 = vadd.f32 %v4166_v41, %v1268_v3 }
 0x17a   : > { %v984_v7 = vpop.f32.mrf.mxu3  ;;  %v1261_v35 = vpop.f32.mrf.mxu2 }
 0x17b   : > { %v1284_v10 = vmax.f32 %v1278_v36, 0.0  ;;  %v1057_v11 = vadd.f32 %v1056_v1, %v984_v7  ;;  %v3600_v36 = vld [vmem:[%s4676_s5 + $0x110] sm:$0xff] }
 0x17d   : > { %v1290_v15 = vpack.c.bf16 %v1284_v10, %v1284_v10  ;;  %v1165_v16 = vadd.f32 %v1154_v5, %v1057_v11  ;;  %v1157_v28 = vpop.f32.mrf.mxu1 }
 0x17f   : > { %v1296_v20 = vunpack.c.l.bf16 %v1290_v15  ;;  %v1269_v21 = vadd.f32 %v1258_v8, %v1165_v16  ;;  %v3599_v16 = vld [vmem:[%s4676_s5 + $0x108] sm:$0xff] }
 0x180   : > { %v4215_v25 = vld [vmem:[#allocation3 + $0x8] sm:$0xff] }
 0x181   : > { %1303 = vst.msk [vmem:[#allocation3 + $0x10] sm:$0xff] %vm1300_vm1, %v1296_v20  ;;  %v1279_v26 = vadd.f32 %v4166_v41, %v1269_v21  ;;  %v1311_v27 = vpack.c.bf16 %v4215_v25, %v1307_v24  ;;  %v1321_v44 = vld [vmem:[#allocation3 + $0x1] sm:$0xff] }
 0x182   : > { %v987_v29 = vpop.f32.mrf.mxu3  ;;  %v1434_v45 = vld [vmem:[#allocation3 + $0x2] sm:$0xff]  ;;  %v1263_v62 = vpop.f32.mrf.mxu2 }
 0x183   : > { %v1285_v30 = vmax.f32 %v1279_v26, 0.0  ;;  %v1060_v31 = vadd.f32 %v1059_v23, %v987_v29  ;;  %3045 = vmatmul.msk.bf16.vlgmr.msra.gmra.mxu0 %vm1300_vm1, %v1311_v27  ;;  %v1502_v46 = vld [vmem:[#allocation3 + $0x7] sm:$0xff] }
 0x185   : > { %v1291_v37 = vpack.c.bf16 %v1285_v30, %v1285_v30  ;;  %v1166_v38 = vadd.f32 %v1157_v28, %v1060_v31  ;;  %v1159_v58 = vpop.f32.mrf.mxu1 }
 0x187   : > { %v1297_v42 = vunpack.c.l.bf16 %v1291_v37  ;;  %v1270_v43 = vadd.f32 %v1261_v35, %v1166_v38 }
 0x188   : > { %v1322_v47 = vld [vmem:[#allocation3 + $0x9] sm:$0xff] }
 0x189   : > { %v1435_v48 = vld [vmem:[#allocation3 + $0xa] sm:$0xff]  ;;  %1304 = vst.msk [vmem:[#allocation3 + $0x18] sm:$0xff] %vm1300_vm1, %v1297_v42  ;;  %v1280_v50 = vadd.f32 %v4166_v41, %v1270_v43  ;;  %v1325_v51 = vpack.c.bf16 %v1322_v47, %v1321_v44 }
 0x18a   : > { %v1503_v49 = vld [vmem:[#allocation3 + $0xf] sm:$0xff]  ;;  %v1438_v52 = vpack.c.bf16 %v1435_v48, %v1434_v45  ;;  %v989_v55 = vpop.f32.mrf.mxu3 }
 0x18b   : > { %v1506_v53 = vpack.c.bf16 %v1503_v49, %v1502_v46  ;;  %v1286_v56 = vmax.f32 %v1280_v50, 0.0  ;;  %v1062_v57 = vadd.f32 %v1061_v54, %v989_v55  ;;  %3027 = vmatmul.msk.bf16.vlgmr.msra.gmra.mxu3 %vm1300_vm1, %v1325_v51  ;;  %v1309_v1 = vld [vmem:[#allocation3 + $0x10] sm:$0xff] }
 0x18c   : > { %3071 = vmatmul.msk.bf16.vlgmr.msra.gmra.mxu1 %vm1300_vm1, %v1438_v52  ;;  %1891 = vmatpush.bf16.msra.mxu3 %v3601_v59  ;;  %v1706_v20 = vld [vmem:[#allocation3 + $0xe] sm:$0xff]  ;;  %v1574_v21 = vpack.c.bf16 %v1309_v1, %v4215_v25 }
 0x18d   : > { %3097 = vmatmul.msk.bf16.vlgmr.msra.gmra.mxu2 %vm1300_vm1, %v1506_v53  ;;  %v1292_v60 = vpack.c.bf16 %v1286_v56, %v1286_v56  ;;  %v1167_v61 = vadd.f32 %v1159_v58, %v1062_v57 }
 0x18f   : > { %v1298_v63 = vunpack.c.l.bf16 %v1292_v60  ;;  %v1271_v0 = vadd.f32 %v1263_v62, %v1167_v61 }
 0x190   : > { %v1310_v2 = vld [vmem:[#allocation3 + $0x18] sm:$0xff]  ;;  %1892 = vmatpush.bf16.msra.mxu3 %v3600_v36 }
 0x191   : > { %1305 = vst.msk [vmem:[#allocation3 + $0x20] sm:$0xff] %vm1300_vm1, %v1298_v63  ;;  %v1281_v3 = vadd.f32 %v4166_v41, %v1271_v0  ;;  %v1312_v4 = vpack.c.bf16 %v1310_v2, %v1309_v1  ;;  %v1323_v8 = vld [vmem:[#allocation3 + $0x11] sm:$0xff] }
 0x192   : > { %v1436_v9 = vld [vmem:[#allocation3 + $0x12] sm:$0xff]  ;;  %v1642_v18 = vpack.c.bf16 %v1323_v8, %v1322_v47 }
 0x193   : > { %v1287_v5 = vmax.f32 %v1281_v3, 0.0  ;;  %3046 = vmatmul.msk.bf16.gmra.mxu0 %vm1300_vm1, %v1312_v4  ;;  %v1504_v10 = vld [vmem:[#allocation3 + $0x17] sm:$0xff] }
 0x194   : > { %1893 = vmatpush.bf16.msra.mxu3 %v3599_v16  ;;  %v1707_v19 = vld [vmem:[#allocation3 + $0x16] sm:$0xff]  ;;  %v1778_v23 = vpack.c.bf16 %v1504_v10, %v1503_v49 }
 0x195   : > { %v1293_v6 = vpack.c.bf16 %v1287_v5, %v1287_v5  ;;  %v1710_v22 = vpack.c.bf16 %v1707_v19, %v1706_v20 }
 0x197   : > { %v1299_v7 = vunpack.c.l.bf16 %v1293_v6 }
 0x198   : > { %v1324_v11 = vld [vmem:[#allocation3 + $0x19] sm:$0xff]  ;;  %1894 = vmatpush.bf16.msra.mxu3 %v3598_v17 }
 0x199   : > { %v1437_v12 = vld [vmem:[#allocation3 + $0x1a] sm:$0xff]  ;;  %1306 = vst.msk [vmem:[#allocation3 + $0x28] sm:$0xff] %vm1300_vm1, %v1299_v7  ;;  %v1326_v41 = vpack.c.bf16 %v1324_v11, %v1323_v8 }
 0x19a   : > { %v1505_v13 = vld [vmem:[#allocation3 + $0x1f] sm:$0xff]  ;;  %v1439_v14 = vpack.c.bf16 %v1437_v12, %v1436_v9 }
 0x19b   : > { %v1507_v15 = vpack.c.bf16 %v1505_v13, %v1504_v10  ;;  %3028 = vmatmul.msk.bf16.gmra.mxu3 %vm1300_vm1, %v1326_v41  ;;  %v1573_v27 = vld [vmem:[#allocation3 + $0x20] sm:$0xff] }
 0x19c   : > { %3072 = vmatmul.msk.bf16.gmra.mxu1 %vm1300_vm1, %v1439_v14  ;;  %v1708_v30 = vld [vmem:[#allocation3 + $0x1e] sm:$0xff]  ;;  %v1575_v31 = vpack.c.bf16 %v1573_v27, %v1310_v2  ;;  %v3709_v14 = vld [vmem:[%s4677_s6] ss:$0 sm:$0xff] }
 0x19d   : > { %3098 = vmatmul.msk.bf16.gmra.mxu2 %vm1300_vm1, %v1507_v15 }
 0x1a0   : > { %v1641_v24 = vld [vmem:[#allocation3 + $0x21] sm:$0xff] }
 0x1a1   : > { %v1643_v26 = vpack.c.bf16 %v1641_v24, %v1324_v11  ;;  %v1709_v28 = vld [vmem:[#allocation3 + $0x26] sm:$0xff] }
 0x1a2   : > { %v1777_v29 = vld [vmem:[#allocation3 + $0x27] sm:$0xff]  ;;  %v1711_v32 = vpack.c.bf16 %v1709_v28, %v1708_v30 }
 0x1a3   : > { %3149 = vmatmul.msk.bf16.vlgmr.msrb.gmra.mxu0 %vm1300_vm1, %v1642_v18  ;;  %v1779_v33 = vpack.c.bf16 %v1777_v29, %v1505_v13  ;;  %v1845_v25 = vld [vmem:[#allocation3 + $0x28] sm:$0xff] }
 0x1a4   : > { %v1847_v34 = vpack.c.bf16 %v1845_v25, %v1573_v27  ;;  %v3229_v29 = vld [vmem:[%s4678_s7 + $0x40] sm:$0xff]  ;;  %v3230_v25 = vld [vmem:[%s4678_s7 + $0x48] sm:$0xff] }
 0x1ab   : > { %3123 = vmatmul.msk.bf16.vlgmr.msrb.gmra.mxu3 %vm1300_vm1, %v1574_v21 }
 0x1ac   : > { %3175 = vmatmul.msk.bf16.vlgmr.msrb.gmra.mxu1 %vm1300_vm1, %v1710_v22 }
 0x1ad   : > { %3201 = vmatmul.msk.bf16.vlgmr.msrb.gmra.mxu2 %vm1300_vm1, %v1778_v23 }
 0x1b3   : > { %3150 = vmatmul.msk.bf16.gmra.mxu0 %vm1300_vm1, %v1643_v26 }
 0x1bb   : > { %3124 = vmatmul.msk.bf16.gmra.mxu3 %vm1300_vm1, %v1575_v31 }
 0x1bc   : > { %3176 = vmatmul.msk.bf16.gmra.mxu1 %vm1300_vm1, %v1711_v32 }
 0x1bd   : > { %3202 = vmatmul.msk.bf16.gmra.mxu2 %vm1300_vm1, %v1779_v33 }
 0x1cb   : > { %3227 = vmatmul.msk.bf16.vlgmr.msra.gmra.mxu3 %vm1300_vm1, %v1312_v4 }
 0x1db   : > { %3228 = vmatmul.msk.bf16.gmra.mxu3 %vm1300_vm1, %v1847_v34 }
 0x200   : > { %v1424_v37 = vpop.f32.mrf.mxu0 }
 0x208   : > { %v1426_v43 = vpop.f32.mrf.mxu0 }
 0x209   : > { %v1488_v39 = vpop.f32.mrf.mxu1 }
 0x20e   : > { %v1375_v35 = vpop.f32.mrf.mxu3 }
 0x20f   : > { %v1425_v53 = vadd.f32 %v1424_v37, %v1375_v35 }
 0x210   : > { %v1556_v40 = vpop.f32.mrf.mxu2  ;;  %v1429_v47 = vpop.f32.mrf.mxu0 }
 0x211   : > { %v1490_v44 = vpop.f32.mrf.mxu1  ;;  %v1498_v55 = vadd.f32 %v1488_v39, %v1425_v53 }
 0x213   : > { %v1566_v59 = vadd.f32 %v1556_v40, %v1498_v55  ;;  %v3231_v55 = vld [vmem:[%s4678_s7 + $0x50] sm:$0xff] }
 0x216   : > { %v1377_v38 = vpop.f32.mrf.mxu3 }
 0x217   : > { %v1427_v60 = vadd.f32 %v1426_v43, %v1377_v38 }
 0x218   : > { %v1558_v46 = vpop.f32.mrf.mxu2  ;;  %v1431_v51 = vpop.f32.mrf.mxu0 }
 0x219   : > { %v1493_v48 = vpop.f32.mrf.mxu1  ;;  %v1499_v63 = vadd.f32 %v1490_v44, %v1427_v60 }
 0x21b   : > { %v1567_v3 = vadd.f32 %v1558_v46, %v1499_v63 }
 0x21e   : > { %v1380_v42 = vpop.f32.mrf.mxu3 }
 0x21f   : > { %v1430_v4 = vadd.f32 %v1429_v47, %v1380_v42 }
 0x220   : > { %v1561_v50 = vpop.f32.mrf.mxu2  ;;  %v1692_v57 = vpop.f32.mrf.mxu0 }
 0x221   : > { %v1495_v54 = vpop.f32.mrf.mxu1  ;;  %v1500_v7 = vadd.f32 %v1493_v48, %v1430_v4 }
 0x223   : > { %v1568_v12 = vadd.f32 %v1561_v50, %v1500_v7 }
 0x226   : > { %v1382_v45 = vpop.f32.mrf.mxu3 }
 0x227   : > { %v1432_v13 = vadd.f32 %v1431_v51, %v1382_v45 }
 0x228   : > { %v1563_v56 = vpop.f32.mrf.mxu2  ;;  %v1694_v5 = vpop.f32.mrf.mxu0 }
 0x229   : > { %v1760_v62 = vpop.f32.mrf.mxu1  ;;  %v1501_v19 = vadd.f32 %v1495_v54, %v1432_v13 }
 0x22b   : > { %v1569_v26 = vadd.f32 %v1563_v56, %v1501_v19 }
 0x22e   : > { %v1624_v49 = vpop.f32.mrf.mxu3 }
 0x22f   : > { %v1634_v61 = vadd.f32 %v1624_v49, %v1566_v59 }
 0x230   : > { %v1828_v1 = vpop.f32.mrf.mxu2  ;;  %v1697_v18 = vpop.f32.mrf.mxu0 }
 0x231   : > { %v1702_v0 = vadd.f32 %v1692_v57, %v1634_v61  ;;  %v1762_v8 = vpop.f32.mrf.mxu1  ;;  %v3232_v57 = vld [vmem:[%s4678_s7 + $0x58] sm:$0xff] }
 0x233   : > { %v1770_v36 = vadd.f32 %v1760_v62, %v1702_v0 }
 0x235   : > { %v1838_v9 = vadd.f32 %v1828_v1, %v1770_v36 }
 0x236   : > { %v1626_v52 = vpop.f32.mrf.mxu3 }
 0x237   : > { %v1635_v6 = vadd.f32 %v1626_v52, %v1567_v3 }
 0x238   : > { %v1830_v15 = vpop.f32.mrf.mxu2  ;;  %v1699_v37 = vpop.f32.mrf.mxu0 }
 0x239   : > { %v1703_v10 = vadd.f32 %v1694_v5, %v1635_v6  ;;  %v1765_v23 = vpop.f32.mrf.mxu1 }
 0x23b   : > { %v1771_v16 = vadd.f32 %v1762_v8, %v1703_v10 }
 0x23d   : > { %v1839_v21 = vadd.f32 %v1830_v15, %v1771_v16  ;;  %v3235_v15 = vld [vmem:[%s4678_s7 + $0x30] sm:$0xff]  ;;  %v3359_v16 = vld [vmem:[%s4679_s8 + $0xe8] sm:$0xf] }
 0x23e   : > { %v1629_v58 = vpop.f32.mrf.mxu3 }
 0x23f   : > { %v1636_v17 = vadd.f32 %v1629_v58, %v1568_v12 }
 0x240   : > { %v1833_v33 = vpop.f32.mrf.mxu2 }
 0x241   : > { %v1704_v22 = vadd.f32 %v1697_v18, %v1636_v17  ;;  %v1767_v46 = vpop.f32.mrf.mxu1  ;;  %v3633_v17 = vld [vmem:[%s4679_s8 + $0xf4] sm:$0xf0]  ;;  %v3631_v18 = vld [vmem:[%s4679_s8 + $0xec] sm:$0xf] }
 0x242   : > { %v3360_v19 = vor.u32 %v3633_v17, %v3359_v16 }
 0x243   : > { %v1772_v30 = vadd.f32 %v1765_v23, %v1704_v22  ;;  %v3632_v22 = vld [vmem:[%s4679_s8 + $0xec] sm:$0xf0] }
 0x244   : > { %2249 = vmatpush.bf16.msra.mxu2 %v3360_v19  ;;  %v3313_v19 = vld [vmem:[%s4679_s8 + $0x98] sm:$0xf0] }
 0x245   : > { %v1840_v38 = vadd.f32 %v1833_v33, %v1772_v30 }
 0x246   : > { %v1631_v2 = vpop.f32.mrf.mxu3 }
 0x247   : > { %v1637_v31 = vadd.f32 %v1631_v2, %v1569_v26 }
 0x248   : > { %v1835_v50 = vpop.f32.mrf.mxu2 }
 0x249   : > { %v1705_v39 = vadd.f32 %v1699_v37, %v1637_v31 }
 0x24b   : > { %v1773_v48 = vadd.f32 %v1767_v46, %v1705_v39 }
 0x24d   : > { %v1841_v51 = vadd.f32 %v1835_v50, %v1773_v48  ;;  %v3628_v48 = vld [vmem:[%s4679_s8 + $0xcc] sm:$0xf0]  ;;  %v1970_v50 = vld [vmem:[%s4678_s7] sm:$0xff] }
 0x24e   : > { %v1896_v11 = vpop.f32.mrf.mxu3 }
 0x24f   : > { %v1906_v41 = vadd.f32 %v1896_v11, %v1838_v9 }
 0x251   : > { %v1914_v20 = vadd.f32 %v3709_v14, %v1906_v41  ;;  %v3233_v41 = vld [vmem:[%s4678_s7 + $0x20] sm:$0xff] }
 0x253   : > { %v1918_v27 = vmax.f32 %v1914_v20, 0.0  ;;  %v3361_v20 = vld [vmem:[%s4679_s8 + $0xf8] sm:$0xf0] }
 0x255   : > { %v1927_v34 = vadd.f32 %v3229_v29, %v1918_v27  ;;  %v3630_v27 = vld [vmem:[%s4679_s8 + $0xe4] sm:$0xf]  ;;  %v3343_v29 = vld [vmem:[%s4679_s8 + $0xc8] sm:$0xf] }
 0x256   : > { %v1898_v24 = vpop.f32.mrf.mxu3 }
 0x257   : > { %v1907_v28 = vadd.f32 %v1898_v24, %v1839_v21  ;;  %v1931_v43 = vsel %vm1300_vm1, %v1927_v34, -inf  ;;  %v3351_v21 = vld [vmem:[%s4679_s8 + $0xe0] sm:$0xf]  ;;  %v3364_v24 = vor.u32 %v3631_v18, %v3361_v20 }
 0x258   : > { %v3352_v26 = vor.u32 %v3632_v22, %v3351_v21  ;;  %v3303_v20 = vld [vmem:[%s4679_s8 + $0x80] sm:$0xf]  ;;  %v1972_v21 = vld [vmem:[%s4678_s7 + $0x10] sm:$0xff] }
 0x259   : > { %v1915_v32 = vadd.f32 %v3709_v14, %v1907_v28  ;;  %v3353_v28 = vld [vmem:[%s4679_s8 + $0xf0] sm:$0xf0]  ;;  %2262 = vmatpush.bf16.msrb.mxu3 %v3364_v24  ;;  %v3620_v24 = vld [vmem:[%s4679_s8 + $0x8c] sm:$0xf0] }
 0x25a   : > { %2223 = vmatpush.bf16.msra.mxu0 %v3352_v26  ;;  %v3618_v26 = vld [vmem:[%s4679_s8 + $0x84] sm:$0xf] }
 0x25b   : > { %v1919_v35 = vmax.f32 %v1915_v32, 0.0  ;;  %v3236_v32 = vld [vmem:[%s4678_s7 + $0x38] sm:$0xff] }
 0x25d   : > { %v1928_v40 = vadd.f32 %v3230_v25, %v1919_v35  ;;  %v3356_v25 = vor.u32 %v3630_v27, %v3353_v28  ;;  %v3627_v35 = vld [vmem:[%s4679_s8 + $0xcc] sm:$0xf]  ;;  %v3305_v27 = vld [vmem:[%s4679_s8 + $0x90] sm:$0xf0] }
 0x25e   : > { %v1901_v42 = vpop.f32.mrf.mxu3 }
 0x25f   : > { %v1932_v44 = vsel %vm1300_vm1, %v1928_v40, -inf  ;;  %v1908_v45 = vadd.f32 %v1901_v42, %v1840_v38  ;;  %v3345_v42 = vld [vmem:[%s4679_s8 + $0xd8] sm:$0xf0]  ;;  %2236 = vmatpush.bf16.msra.mxu1 %v3356_v25 }
 0x260   : > { %v1935_v47 = vmax.f32 %v1931_v43, %v1932_v44  ;;  %v3335_v43 = vld [vmem:[%s4679_s8 + $0xc0] sm:$0xf] }
 0x261   : > { %v1916_v49 = vadd.f32 %v3709_v14, %v1908_v45 }
 0x263   : > { %v1920_v53 = vmax.f32 %v1916_v49, 0.0  ;;  %v3626_v49 = vld [vmem:[%s4679_s8 + $0xc4] sm:$0xf] }
 0x265   : > { %v1929_v58 = vadd.f32 %v3231_v55, %v1920_v53  ;;  %v3337_v55 = vld [vmem:[%s4679_s8 + $0xd0] sm:$0xf0] }
 0x266   : > { %v1903_v52 = vpop.f32.mrf.mxu3 }
 0x267   : > { %v1909_v54 = vadd.f32 %v1903_v52, %v1841_v51  ;;  %v1933_v61 = vsel %vm1300_vm1, %v1929_v58, -inf }
 0x269   : > { %v1917_v56 = vadd.f32 %v3709_v14, %v1909_v54  ;;  %v3234_v14 = vld [vmem:[%s4678_s7 + $0x28] sm:$0xff]  ;;  %v3348_v54 = vor.u32 %v3627_v35, %v3345_v42 }
 0x26a   : > { %v3615_v35 = vld [vmem:[%s4679_s8 + $0x6c] sm:$0xf] }
 0x26b   : > { %v1921_v59 = vmax.f32 %v1917_v56, 0.0  ;;  %v3327_v56 = vld [vmem:[%s4679_s8 + $0xa8] sm:$0xf]  ;;  %2263 = vmatpush.bf16.msrb.mxu3 %v3348_v54 }
 0x26d   : > { %v1930_v60 = vadd.f32 %v3232_v57, %v1921_v59 }
 0x26f   : > { %v1934_v62 = vsel %vm1300_vm1, %v1930_v60, -inf }
 0x270   : > { %v1936_v63 = vmax.f32 %v1933_v61, %v1934_v62  ;;  %v3625_v61 = vld [vmem:[%s4679_s8 + $0xb4] sm:$0xf0]  ;;  %v3623_v62 = vld [vmem:[%s4679_s8 + $0xac] sm:$0xf] }
 0x272   : > { %v1937_v0 = vmax.f32 %v1935_v47, %v1936_v63  ;;  %v1971_v63 = vld [vmem:[%s4678_s7 + $0x8] sm:$0xff] }
 0x274   : > { %v1938_v1 = vrot.slane %v1937_v0, 4 }
 0x276   : > { %v1939_v2 = vmax.f32 %v1937_v0, %v1938_v1 }
 0x278   : > { %v1940_v3 = vrot.slane %v1939_v2, 2 }
 0x27a   : > { %v1941_v4 = vmax.f32 %v1939_v2, %v1940_v3  ;;  %v3340_v2 = vor.u32 %v3626_v49, %v3337_v55  ;;  %v3328_v3 = vor.u32 %v3625_v61, %v3327_v56  ;;  %v3611_v56 = vld [vmem:[%s4679_s8 + $0x4c] sm:$0xf] }
 0x27c   : > { %v1942_v5 = vrot.slane %v1941_v4, 1  ;;  %2237 = vmatpush.bf16.msra.mxu1 %v3340_v2 }
 0x27e   : > { %v1943_v36 = vmax.f32 %v1941_v4, %v1942_v5  ;;  %v3329_v4 = vld [vmem:[%s4679_s8 + $0xb8] sm:$0xf0]  ;;  %v3319_v5 = vld [vmem:[%s4679_s8 + $0xa0] sm:$0xf] }
 0x280   : > { %v1944_v6 = vsub.f32 %v1927_v34, %v1943_v36  ;;  %v1945_v7 = vsub.f32 %v1928_v40, %v1943_v36  ;;  %v1946_v8 = vsub.f32 %v1929_v58, %v1943_v36  ;;  %v1947_v9 = vsub.f32 %v1930_v60, %v1943_v36  ;;  %v3629_v34 = vld [vmem:[%s4679_s8 + $0xd4] sm:$0xf0] }
 0x281   : > { %v3344_v40 = vor.u32 %v3629_v34, %v3343_v29  ;;  %v3336_v60 = vor.u32 %v3628_v48, %v3335_v43  ;;  %v3308_v34 = vor.u32 %v3618_v26, %v3305_v27 }
 0x282   : > { %v1948_v10 = vmul.f32 1.442695, %v1944_v6  ;;  %v1950_v11 = vmul.f32 1.442695, %v1945_v7  ;;  %v1952_v12 = vmul.f32 1.442695, %v1946_v8  ;;  %v3332_v7 = vor.u32 %v3623_v62, %v3329_v4 }
 0x283   : > { %v1954_v13 = vmul.f32 1.442695, %v1947_v9  ;;  %2250 = vmatpush.bf16.msra.mxu2 %v3344_v40  ;;  %2224 = vmatpush.bf16.msra.mxu0 %v3336_v60  ;;  %v3624_v8 = vld [vmem:[%s4679_s8 + $0xac] sm:$0xf0]  ;;  %v3622_v9 = vld [vmem:[%s4679_s8 + $0xa4] sm:$0xf] }
 0x284   : > { %3710 = vpow2.f32 %v1948_v10  ;;  %v3321_v10 = vld [vmem:[%s4679_s8 + $0xb0] sm:$0xf0]  ;;  %2264 = vmatpush.bf16.msrb.mxu3 %v3332_v7  ;;  %v3612_v60 = vld [vmem:[%s4679_s8 + $0x4c] sm:$0xf0] }
 0x285   : > { %3712 = vpow2.f32 %v1950_v11 }
 0x286   : > { %3714 = vpow2.f32 %v1952_v12  ;;  %v3320_v12 = vor.u32 %v3624_v8, %v3319_v5  ;;  %v3609_v5 = vld [vmem:[%s4679_s8 + $0x34] sm:$0xf0]  ;;  %v3607_v8 = vld [vmem:[%s4679_s8 + $0x2c] sm:$0xf] }
 0x287   : > { %3716 = vpow2.f32 %v1954_v13  ;;  %v3324_v13 = vor.u32 %v3622_v9, %v3321_v10  ;;  %2251 = vmatpush.bf16.msra.mxu2 %v3328_v3  ;;  %v3265_v9 = vld [vmem:[%s4679_s8 + $0x38] sm:$0xf0] }
 0x288   : > { %2225 = vmatpush.bf16.msra.mxu0 %v3320_v12  ;;  %v3608_v12 = vld [vmem:[%s4679_s8 + $0x2c] sm:$0xf0] }
 0x289   : > { %2238 = vmatpush.bf16.msra.mxu1 %v3324_v13 }
 0x28a   : > { %v3711_v23 = vpop.eup %3710 }
 0x28b   : > { %v4326_v30 = vpop.eup %3712  ;;  %v1956_v31 = vsel %vm1300_vm1, %v3711_v23, 0.0  ;;  %v1997_v33 = vmul.f32 %v3711_v23, %v3233_v41  ;;  %v1974_v11 = vmul.f32 %v3711_v23, %v1970_v50  ;;  %v3311_v41 = vld [vmem:[%s4679_s8 + $0x88] sm:$0xf] }
 0x28c   : > { %v4338_v37 = vpop.eup %3714  ;;  %v1957_v38 = vsel %vm1300_vm1, %v4326_v30, 0.0  ;;  %v1998_v39 = vmul.f32 %v4326_v30, %v3234_v14  ;;  %v3621_v14 = vld [vmem:[%s4679_s8 + $0x94] sm:$0xf0]  ;;  %v1975_v22 = vmul.f32 %v4326_v30, %v1971_v63  ;;  %v3295_v30 = vld [vmem:[%s4679_s8 + $0x68] sm:$0xf] }
 0x28d   : > { %v4349_v44 = vpop.eup %3716  ;;  %v1958_v45 = vadd.f32 %v1957_v38, %v1956_v31  ;;  %v1999_v46 = vmul.f32 %v4338_v37, %v3235_v15  ;;  %v2001_v47 = vsel %vm1300_vm1, %v1997_v33, 0.0  ;;  %v1959_v51 = vsel %vm1300_vm1, %v4338_v37, 0.0  ;;  %v3619_v15 = vld [vmem:[%s4679_s8 + $0x8c] sm:$0xf]  ;;  %v1973_v33 = vld [vmem:[%s4678_s7 + $0x18] sm:$0xff]  ;;  %2239 = vmatpush.bf16.msra.mxu1 %v3308_v34 }
 0x28e   : > { %v2000_v52 = vmul.f32 %v4349_v44, %v3236_v32  ;;  %v2002_v53 = vsel %vm1300_vm1, %v1998_v39, 0.0  ;;  %v1961_v58 = vsel %vm1300_vm1, %v4349_v44, 0.0  ;;  %v3312_v18 = vor.u32 %v3621_v14, %v3311_v41  ;;  %v3617_v32 = vld [vmem:[%s4679_s8 + $0x74] sm:$0xf0]  ;;  %v3297_v38 = vld [vmem:[%s4679_s8 + $0x78] sm:$0xf0] }
 0x28f   : > { %v1960_v57 = vadd.f32 %v1959_v51, %v1958_v45  ;;  %v2003_v59 = vadd.f32 %v2002_v53, %v2001_v47  ;;  %v2004_v0 = vsel %vm1300_vm1, %v1999_v46, 0.0  ;;  %v3316_v23 = vor.u32 %v3619_v15, %v3313_v19  ;;  %v3287_v39 = vld [vmem:[%s4679_s8 + $0x60] sm:$0xf]  ;;  %v3616_v46 = vld [vmem:[%s4679_s8 + $0x6c] sm:$0xf0] }
 0x290   : > { %v2006_v1 = vsel %vm1300_vm1, %v2000_v52, 0.0  ;;  %v3304_v31 = vor.u32 %v3620_v24, %v3303_v20  ;;  %v1978_v25 = vsel %vm1300_vm1, %v1974_v11, 0.0  ;;  %v1976_v40 = vmul.f32 %v4338_v37, %v1972_v21  ;;  %2252 = vmatpush.bf16.msra.mxu2 %v3312_v18  ;;  %v3614_v47 = vld [vmem:[%s4679_s8 + $0x64] sm:$0xf]  ;;  %v3289_v37 = vld [vmem:[%s4679_s8 + $0x70] sm:$0xf0] }
 0x291   : > { %v1962_v36 = vadd.f32 %v1961_v58, %v1960_v57  ;;  %v2005_v6 = vadd.f32 %v2004_v0, %v2003_v59  ;;  %v3296_v45 = vor.u32 %v3617_v32, %v3295_v30  ;;  %v1979_v48 = vsel %vm1300_vm1, %v1975_v22, 0.0  ;;  %2265 = vmatpush.bf16.msrb.mxu3 %v3316_v23  ;;  %v3279_v50 = vld [vmem:[%s4679_s8 + $0x48] sm:$0xf]  ;;  %v3613_v51 = vld [vmem:[%s4679_s8 + $0x54] sm:$0xf0] }
 0x292   : > { %v3300_v49 = vor.u32 %v3615_v35, %v3297_v38  ;;  %v1980_v52 = vadd.f32 %v1979_v48, %v1978_v25  ;;  %2226 = vmatpush.bf16.msra.mxu0 %v3304_v31  ;;  %v3288_v55 = vor.u32 %v3616_v46, %v3287_v39  ;;  %v3281_v57 = vld [vmem:[%s4679_s8 + $0x58] sm:$0xf0]  ;;  %v3292_v58 = vor.u32 %v3614_v47, %v3289_v37  ;;  %v3271_v59 = vld [vmem:[%s4679_s8 + $0x40] sm:$0xf]  ;;  %v3610_v0 = vld [vmem:[%s4679_s8 + $0x44] sm:$0xf] }
 0x293   : > { %v1963_v16 = vrot.slane %v1962_v36, 4  ;;  %v2007_v17 = vadd.f32 %v2006_v1, %v2005_v6  ;;  %v1977_v61 = vmul.f32 %v4349_v44, %v1973_v33  ;;  %v3280_v63 = vor.u32 %v3613_v51, %v3279_v50  ;;  %v3273_v1 = vld [vmem:[%s4679_s8 + $0x50] sm:$0xf0]  ;;  %v3263_v44 = vld [vmem:[%s4679_s8 + $0x28] sm:$0xf]  ;;  %v3641_v47 = vld [vmem:[%s4681_s10 + $0x38] sm:$0xff] }
 0x294   : > { %2253 = vmatpush.bf16.msra.mxu2 %v3296_v45  ;;  %v1981_v2 = vsel %vm1300_vm1, %v1976_v40, 0.0  ;;  %v3284_v4 = vor.u32 %v3611_v56, %v3281_v57  ;;  %v3272_v7 = vor.u32 %v3612_v60, %v3271_v59  ;;  %2240 = vmatpush.bf16.msra.mxu1 %v3292_v58  ;;  %v3276_v10 = vor.u32 %v3610_v0, %v3273_v1  ;;  %v3255_v11 = vld [vmem:[%s4679_s8 + $0x20] sm:$0xf]  ;;  %v3606_v14 = vld [vmem:[%s4679_s8 + $0x24] sm:$0xf]  ;;  %v3649_v48 = vld [vmem:[%s4681_s10 + $0x78] sm:$0xff] }
 0x295   : > { %v1964_v28 = vadd.f32 %v1963_v16, %v1962_v36  ;;  %v2008_v29 = vrot.slane %v2007_v17, 4  ;;  %2266 = vmatpush.bf16.msrb.mxu3 %v3300_v49  ;;  %v1982_v36 = vadd.f32 %v1981_v2, %v1980_v52  ;;  %v1983_v13 = vsel %vm1300_vm1, %v1977_v61, 0.0  ;;  %v3257_v15 = vld [vmem:[%s4679_s8 + $0x30] sm:$0xf0]  ;;  %v3247_v32 = vld [vmem:[%s4679_s8 + $0x8] sm:$0xf] }
 0x296   : > { %2227 = vmatpush.bf16.msra.mxu0 %v3288_v55  ;;  %v3264_v41 = vor.u32 %v3609_v5, %v3263_v44  ;;  %v3268_v18 = vor.u32 %v3607_v8, %v3265_v9  ;;  %v3256_v19 = vor.u32 %v3608_v12, %v3255_v11  ;;  %v3260_v21 = vor.u32 %v3606_v14, %v3257_v15  ;;  %v3605_v33 = vld [vmem:[%s4679_s8 + $0x14] sm:$0xf0]  ;;  %v3603_v25 = vld [vmem:[%s4679_s8 + $0xc] sm:$0xf]  ;;  %v3249_v35 = vld [vmem:[%s4679_s8 + $0x18] sm:$0xf0] }
 0x297   : > { %v1965_v42 = vrot.slane %v1964_v28, 2  ;;  %v2009_v43 = vadd.f32 %v2008_v29, %v2007_v17  ;;  %v1984_v16 = vadd.f32 %v1983_v13, %v1982_v36  ;;  %v3248_v34 = vor.u32 %v3605_v33, %v3247_v32  ;;  %v3239_v38 = vld [vmem:[%s4679_s8] sm:$0xf]  ;;  %v3604_v39 = vld [vmem:[%s4679_s8 + $0xc] sm:$0xf0]  ;;  %v3657_v49 = vld [vmem:[%s4681_s10 + $0xb8] sm:$0xff] }
 0x298   : > { %2254 = vmatpush.bf16.msra.mxu2 %v3280_v63  ;;  %2241 = vmatpush.bf16.msra.mxu1 %v3276_v10  ;;  %v3252_v40 = vor.u32 %v3603_v25, %v3249_v35  ;;  %v3241_v45 = vld [vmem:[%s4679_s8 + $0x10] sm:$0xf0]  ;;  %v3665_v37 = vld [vmem:[%s4681_s10 + $0xf8] sm:$0xff]  ;;  %v3647_v55 = vld [vmem:[%s4681_s10 + $0x68] sm:$0xff] }
 0x299   : > { %v1966_v53 = vadd.f32 %v1965_v42, %v1964_v28  ;;  %v2010_v54 = vrot.slane %v2009_v43, 2  ;;  %2267 = vmatpush.bf16.msrb.mxu3 %v3284_v4  ;;  %v1985_v20 = vrot.slane %v1984_v16, 4  ;;  %v3240_v42 = vor.u32 %v3604_v39, %v3239_v38  ;;  %v3640_v50 = vld [vmem:[%s4681_s10 + $0x30] sm:$0xff]  ;;  %v3655_v56 = vld [vmem:[%s4681_s10 + $0xa8] sm:$0xff]  ;;  %v3638_v58 = vld [vmem:[%s4681_s10 + $0x20] sm:$0xff] }
 0x29a   : > { %2228 = vmatpush.bf16.msra.mxu0 %v3272_v7  ;;  %v3648_v51 = vld [vmem:[%s4681_s10 + $0x70] sm:$0xff]  ;;  %v3663_v57 = vld [vmem:[%s4681_s10 + $0xe8] sm:$0xff]  ;;  %v3646_v59 = vld [vmem:[%s4681_s10 + $0x60] sm:$0xff] }
 0x29b   : > { %v1967_v62 = vrot.slane %v1966_v53, 1  ;;  %v2011_v3 = vadd.f32 %v2010_v54, %v2009_v43  ;;  %v1986_v22 = vadd.f32 %v1985_v20, %v1984_v16  ;;  %v3602_v43 = vld [vmem:[%s4679_s8 + $0x4] sm:$0xf]  ;;  %v3656_v52 = vld [vmem:[%s4681_s10 + $0xb0] sm:$0xff]  ;;  %v3639_v54 = vld [vmem:[%s4681_s10 + $0x28] sm:$0xff] }
 0x29c   : > { %2255 = vmatpush.bf16.msra.mxu2 %v3264_v41  ;;  %2242 = vmatpush.bf16.msra.mxu1 %v3260_v21  ;;  %v3244_v46 = vor.u32 %v3602_v43, %v3241_v45  ;;  %v3654_v60 = vld [vmem:[%s4681_s10 + $0xa0] sm:$0xff]  ;;  %v3645_v63 = vld [vmem:[%s4681_s10 + $0x58] sm:$0xff]  ;;  %v3636_v2 = vld [vmem:[%s4681_s10 + $0x10] sm:$0xff] }
 0x29d   : > { %v1968_v6 = vadd.f32 %v1967_v62, %v1966_v53  ;;  %v2012_v17 = vrot.slane %v2011_v3, 1  ;;  %2268 = vmatpush.bf16.msrb.mxu3 %v3268_v18  ;;  %v1987_v26 = vrot.slane %v1986_v22, 2  ;;  %v3664_v53 = vld [vmem:[%s4681_s10 + $0xf0] sm:$0xff]  ;;  %v3662_v61 = vld [vmem:[%s4681_s10 + $0xe0] sm:$0xff]  ;;  %v3637_v62 = vld [vmem:[%s4681_s10 + $0x18] sm:$0xff] }
 0x29e   : > { %2229 = vmatpush.bf16.msra.mxu0 %v3256_v19  ;;  %v3653_v0 = vld [vmem:[%s4681_s10 + $0x98] sm:$0xff]  ;;  %v3635_v36 = vld [vmem:[%s4681_s10 + $0x8] sm:$0xff]  ;;  %v3652_v7 = vld [vmem:[%s4681_s10 + $0x90] sm:$0xff] }
 0x29f   : > { %3718 = vrcp.f32 %v1968_v6  ;;  %v2013_v23 = vadd.f32 %v2012_v17, %v2011_v3  ;;  %v1988_v28 = vadd.f32 %v1987_v26, %v1986_v22  ;;  %v3661_v1 = vld [vmem:[%s4681_s10 + $0xd8] sm:$0xff]  ;;  %v3644_v3 = vld [vmem:[%s4681_s10 + $0x50] sm:$0xff]  ;;  %v3643_v6 = vld [vmem:[%s4681_s10 + $0x48] sm:$0xff] }
 0x2a0   : > { %2256 = vmatpush.bf16.msra.mxu2 %v3248_v34  ;;  %2243 = vmatpush.bf16.msra.mxu1 %v3244_v46  ;;  %v3660_v8 = vld [vmem:[%s4681_s10 + $0xd0] sm:$0xff]  ;;  %v3634_v9 = vld [vmem:[%s4681_s10] sm:$0xff]  ;;  %v3651_v11 = vld [vmem:[%s4681_s10 + $0x88] sm:$0xff] }
 0x2a1   : > { %v1989_v29 = vrot.slane %v1988_v28, 1  ;;  %2269 = vmatpush.bf16.msrb.mxu3 %v3252_v40  ;;  %v3642_v10 = vld [vmem:[%s4681_s10 + $0x40] sm:$0xff]  ;;  %v3659_v12 = vld [vmem:[%s4681_s10 + $0xc8] sm:$0xff] }
 0x2a2   : > { %2230 = vmatpush.bf16.msra.mxu0 %v3240_v42  ;;  %v3650_v13 = vld [vmem:[%s4681_s10 + $0x80] sm:$0xff] }
 0x2a3   : > { %v1990_v31 = vadd.f32 %v1989_v29, %v1988_v28  ;;  %v3658_v41 = vld [vmem:[%s4681_s10 + $0xc0] sm:$0xff] }
 0x2a4   : > { %2553 = vmatpush.bf16.msrb.mxu1 %v3649_v48  ;;  %2566 = vmatpush.bf16.msrb.mxu2 %v3657_v49  ;;  %v2053_v14 = vld [vmem:[%s4680_s9] sm:$0xf] }
 0x2a5   : > { %v3719_v24 = vpop.eup %3718  ;;  %2579 = vmatpush.bf16.msra.mxu3 %v3665_v37  ;;  %v2215_v15 = vperm.slane %v2053_v14, 0  ;;  %v2216_v16 = vperm.slane %v2053_v14, 1  ;;  %v2347_v45 = vld [vmem:[%s4682_s11] sm:$0x1] }
 0x2a6   : > { %v2014_v27 = vmul.f32 %v3719_v24, %v2013_v23  ;;  %v4509_v30 = vmul.f32 %v3719_v24, %v1990_v31  ;;  %2540 = vmatpush.bf16.msrb.mxu0 %v3641_v47  ;;  %v2217_v23 = vperm.slane %v2053_v14, 2  ;;  %v2218_v24 = vperm.slane %v2053_v14, 3 }
 0x2a8   : > { %2016 = vrot.lane.b32.xlu0 %v2014_v27, %s3784_s19  ;;  %2554 = vmatpush.bf16.msrb.mxu1 %v3648_v51  ;;  %s3740_s19 = scalar_lea.hbm %s4683_s12, 2 }
 0x2a9   : > { %2567 = vmatpush.bf16.msrb.mxu2 %v3656_v52  ;;  %2580 = vmatpush.bf16.msra.mxu3 %v3664_v53  ;;  %p3742_p1 = scmp.lt.s32.totalorder %s3740_s19, %s3736_s26 }
 0x2aa   : > { %2541 = vmatpush.bf16.msrb.mxu0 %v3640_v50 }
 0x2ab   : > { %p3743_p2 = por %p3742_p1, %p3741_p0 }
 0x2ac   : > { %2555 = vmatpush.bf16.msrb.mxu1 %v3647_v55 }
 0x2ad   : > { %2568 = vmatpush.bf16.msrb.mxu2 %v3655_v56  ;;  %2581 = vmatpush.bf16.msra.mxu3 %v3663_v57  ;;  %p3744_p3 = pnand %p3743_p2, %p3739_p13 }
 0x2ae   : > { %2542 = vmatpush.bf16.msrb.mxu0 %v3639_v54 }
 0x2b0   : > { %2556 = vmatpush.bf16.msrb.mxu1 %v3646_v59 }
 0x2b1   : > { %2569 = vmatpush.bf16.msrb.mxu2 %v3654_v60  ;;  %2582 = vmatpush.bf16.msra.mxu3 %v3662_v61 }
 0x2b2   : > { %2543 = vmatpush.bf16.msrb.mxu0 %v3638_v58 }
 0x2b4   : > { %2557 = vmatpush.bf16.msrb.mxu1 %v3645_v63 }
 0x2b5   : > { %2570 = vmatpush.bf16.msrb.mxu2 %v3653_v0  ;;  %2583 = vmatpush.bf16.msra.mxu3 %v3661_v1 }
 0x2b6   : > { %2544 = vmatpush.bf16.msrb.mxu0 %v3637_v62 }
 0x2b8   : > { %2558 = vmatpush.bf16.msrb.mxu1 %v3644_v3 }
 0x2b9   : > { %2571 = vmatpush.bf16.msrb.mxu2 %v3652_v7  ;;  %2584 = vmatpush.bf16.msra.mxu3 %v3660_v8 }
 0x2ba   : > { %2545 = vmatpush.bf16.msrb.mxu0 %v3636_v2 }
 0x2bc   : > { %2559 = vmatpush.bf16.msrb.mxu1 %v3643_v6 }
 0x2bd   : > { %2572 = vmatpush.bf16.msrb.mxu2 %v3651_v11  ;;  %2585 = vmatpush.bf16.msra.mxu3 %v3659_v12 }
 0x2be   : > { %2546 = vmatpush.bf16.msrb.mxu0 %v3635_v36 }
 0x2c0   : > { %2560 = vmatpush.bf16.msrb.mxu1 %v3642_v10 }
 0x2c1   : > { %2573 = vmatpush.bf16.msrb.mxu2 %v3650_v13  ;;  %2586 = vmatpush.bf16.msra.mxu3 %v3658_v41 }
 0x2c2   : > { %2547 = vmatpush.bf16.msrb.mxu0 %v3634_v9 }
 0x31a   : > { %v2017_v4 = vpop.permute.xlu0 %2016 }
 0x31b   : > { %v2019_v44 = vsel %vm1300_vm1, %v4509_v30, %v2017_v4 }
 0x31c   : > { %v2020_v5 = vpack.c.bf16 %v2019_v44, %v2019_v44 }
 0x31e   : > { %2231 = vmatmul.bf16.vlgmr.msra.gmra.mxu0 %v2020_v5  ;;  %2244 = vmatmul.bf16.vlgmr.msra.gmra.mxu1 %v2020_v5 }
 0x31f   : > { %2257 = vmatmul.bf16.vlgmr.msra.gmra.mxu2 %v2020_v5  ;;  %2270 = vmatmul.bf16.vlgmr.msrb.gmra.mxu3 %v2020_v5 }
 0x39b   : > { %v2232_v17 = vpop.f32.mrf.mxu0  ;;  %v2245_v18 = vpop.f32.mrf.mxu1 }
 0x39c   : > { %v2233_v19 = vadd.f32 %v2232_v17, %v2215_v15  ;;  %v2246_v20 = vadd.f32 %v2245_v18, %v2216_v16 }
 0x39e   : > { %v2275_v21 = vmax.f32 %v2233_v19, 0.0  ;;  %v2276_v22 = vmax.f32 %v2246_v20, 0.0 }
 0x3a0   : > { %v2279_v26 = vpack.c.bf16 %v2275_v21, %v2275_v21  ;;  %v2280_v27 = vpack.c.bf16 %v2276_v22, %v2276_v22 }
 0x3a2   : > { %v2258_v28 = vpop.f32.mrf.mxu2  ;;  %v2271_v29 = vpop.f32.mrf.mxu3  ;;  %2548 = vmatmul.bf16.vlgmr.msrb.gmra.mxu0 %v2279_v26  ;;  %2561 = vmatmul.bf16.vlgmr.msrb.gmra.mxu1 %v2280_v27 }
 0x3a3   : > { %v2259_v31 = vadd.f32 %v2258_v28, %v2217_v23  ;;  %v2272_v30 = vadd.f32 %v2271_v29, %v2218_v24  ;;  %v2234_v32 = vpop.f32.mrf.mxu0  ;;  %v2247_v33 = vpop.f32.mrf.mxu1 }
 0x3a5   : > { %v2277_v25 = vmax.f32 %v2259_v31, 0.0  ;;  %v2278_v34 = vmax.f32 %v2272_v30, 0.0 }
 0x3a7   : > { %v2281_v35 = vpack.c.bf16 %v2277_v25, %v2277_v25  ;;  %v2282_v38 = vpack.c.bf16 %v2278_v34, %v2278_v34 }
 0x3a9   : > { %2574 = vmatmul.bf16.vlgmr.msrb.gmra.mxu2 %v2281_v35  ;;  %2587 = vmatmul.bf16.vlgmr.msra.gmra.mxu3 %v2282_v38 }
 0x3aa   : > { %v2260_v39 = vpop.f32.mrf.mxu2  ;;  %v2273_v40 = vpop.f32.mrf.mxu3 }
 0x41f   : > { %v2549_v42 = vpop.f32.mrf.mxu0  ;;  %v2562_v43 = vpop.f32.mrf.mxu1 }
 0x420   : > { %v2550_v46 = vadd.f32 %v2549_v42, %v2347_v45 }
 0x422   : > { %v2563_v49 = vadd.f32 %v2562_v43, %v2550_v46 }
 0x427   : > { %v2551_v47 = vpop.f32.mrf.mxu0  ;;  %v2564_v48 = vpop.f32.mrf.mxu1 }
 0x42c   : > { %v2575_v37 = vpop.f32.mrf.mxu2  ;;  %v2588_v50 = vpop.f32.mrf.mxu3 }
 0x42d   : > { %v2576_v51 = vadd.f32 %v2575_v37, %v2563_v49 }
 0x42f   : > { %v2589_v52 = vadd.f32 %v2588_v50, %v2576_v51 }
 0x431   : > { %2593 = vst.msk [vmem:[%s405_s30] sm:$0x1] %vm2592_vm2, %v2589_v52 }
 0x432   : > { %3747 = shalt.err (!%p3744_p3)
}
 0x433   : > { %3667 = dma.vmem_to_hbm [thread:$0]  (%p3888_p5), %s2606_s17, 16, %s2608_s16, %s2595_s18  }
 0x434   : > { %v2577_v53 = vpop.f32.mrf.mxu2  ;;  %v2590_v54 = vpop.f32.mrf.mxu3 }
 0x435 PF: > { %p3673_p4 = scmp.ge.s32.totalorder %s3782_s24, 2  ;;  %s2619_s28 = sand.u32 1, %s3770_s21  }
 0x436   : > { %s2620_s20 = scalar_lea.sflag [#allocation5], %s2619_s28 }
 0x437   : > { %p3670_p7 = pnand %p3673_p4, %p3892_p6 }
 0x439   : > { %p3671_p8 = pneg %p3670_p7 }
 0x43b   : > { %3765 = dma.done.wait (%p3671_p8), %s2620_s20, 16  }
 0x43c   : > { %3767 = vsyncadd (%p3671_p8), %s2620_s20, 4294967280  ;;  %s4692_s24 = sld [smem:[#allocation8_spill]]  ;;  %s4695_s21 = smov %s3774_s22 }
 0x43d   : > { %s4693_s30 = sld [smem:[#allocation7_spill]] }
 0x43e   : > { %s4694_s23 = sld [smem:[#allocation9_spill]] }
 0x442   : > { %p22_p5 = scmp.ge.s32.totalorder %s4692_s24, 4  }
 0x443   : > { %s4696_s22 = smov %s4693_s30 }
 0x444   :  { %24 = sbr.rel (!%p22_p5) target bundleno = 3 (0x3), region = 116 }
 0x449   :  { %2625 = vsyncpa [#allocation5], 1 }
 0x44a   :  { %2627 = vsyncpa [#allocation5 + $0x1], 1 }

</bundles_post_ra>
